<compile_context>
chip_gen: v5e
topology: v5e:2x2
jax: 0.10.0
libtpu: 0.0.40
codegen_flags: <defaults>
</compile_context>

<pallas_src>
import functools
import math

import jax
import jax.numpy as jnp
from jax.experimental import pallas as pl
from jax.experimental.pallas import tpu as pltpu


# ------------------------------ helpers ---------------------------------------


def _layernorm(y, gamma, beta, eps=1e-5):
    # Fused moments: var = E[y^2] - mean^2 (inputs are residual-stream
    # activations with ~zero mean, so cancellation is benign; clamp anyway).
    mean = jnp.mean(y, axis=-1, keepdims=True)
    msq = jnp.mean(y * y, axis=-1, keepdims=True)
    var = jnp.maximum(msq - mean * mean, 0.0)
    return (y - mean) * jax.lax.rsqrt(var + eps) * gamma + beta


def _reciprocal(x):
    # EUP approximate reciprocal + one Newton step: avoids the vector divide
    # while staying within ~1 ulp of the exact result.
    r = pl.reciprocal(x, approx=True)
    return r * (2.0 - x * r)


# ------------------------------ kernel -----------------------------------------


def encoder_kernel(h, q_dim, v_dim, dot_dtype,
                   x_ref,
                   wqkv_ref, bqkv_ref,
                   wo_ref, bo_ref,
                   g1_ref, be1_ref,
                   w1_ref, b1_ref, w2_ref, b2_ref,
                   g2_ref, be2_ref,
                   out_ref, score_ref):
    nb, s, d = x_ref.shape                                     # (block_b, S, d_model)
    x = x_ref[...].reshape(nb * s, d)                          # fold batch into matmul rows

    hq = h * q_dim
    hv = h * v_dim

    # Fused Q/K/V projection: one MXU pass with N = 2*h*q + h*v.  Kept in f32 so
    # the returned scores stay faithful to PyTorch even when dot_dtype=bf16.
    qkv = jnp.dot(x, wqkv_ref[...], preferred_element_type=jnp.float32) + bqkv_ref[...]

    def fold_heads(t, dim):
        # (nb*s, h*dim) -> (h*nb, s, dim): heads become the leading (head-major)
        # batch dim, so the (h, nb, S, S) score slab below is a free reshape.
        t = t.reshape(nb, s, h, dim)
        return jnp.transpose(t, (2, 0, 1, 3)).reshape(h * nb, s, dim)

    q = fold_heads(qkv[:, :hq] * (1.0 / math.sqrt(q_dim)), q_dim)   # 1/sqrt(q) folded once
    k = fold_heads(qkv[:, hq:2 * hq], q_dim)
    v = fold_heads(qkv[:, 2 * hq:2 * hq + hv], v_dim)

    # One batched QK^T over all (head, batch) pairs -- single MXU stream.
    score = jnp.einsum("bsq,bkq->bsk", q, k, preferred_element_type=jnp.float32)
    score_ref[...] = score.reshape(h, nb, s, s)                     # raw pre-softmax scores

    # Numerically-stable softmax over keys.
    # TODO(synk): on v6e/v7x the exp could run in bf16 on the EUP for ~2x
    # transcendental throughput; kept f32 for fidelity.
    m = jnp.max(score, axis=-1, keepdims=True)
    e = jnp.exp(score - m)
    p = e * _reciprocal(jnp.sum(e, axis=-1, keepdims=True))

    attn = jnp.einsum("bsk,bkv->bsv", p.astype(dot_dtype), v.astype(dot_dtype),
                      preferred_element_type=jnp.float32)           # (h*nb, s, v_dim)
    # Merge heads back onto the lane axis (torch head-major column order) with a
    # reshape/transpose -- no lane-minor concatenate.
    attn = jnp.transpose(attn.reshape(h, nb, s, v_dim), (1, 2, 0, 3)).reshape(nb * s, hv)

    sa = jnp.dot(attn.astype(dot_dtype), wo_ref[...],
                 preferred_element_type=jnp.float32) + bo_ref[...]

    # TODO(synk): dropout is identity here (inference / eval mode).
    x1 = _layernorm(sa + x, g1_ref[...], be1_ref[...])

    hidden = jnp.maximum(
        jnp.dot(x1.astype(dot_dtype), w1_ref[...],
                preferred_element_type=jnp.float32) + b1_ref[...], 0.0)
    ff = jnp.dot(hidden.astype(dot_dtype), w2_ref[...],
                 preferred_element_type=jnp.float32) + b2_ref[...]

    out_ref[...] = _layernorm(ff + x1, g2_ref[...], be2_ref[...]).reshape(nb, s, d)


# ------------------------------ wrapper -----------------------------------------


def _physical_vmem_bytes():
    try:
        return int(pltpu.get_tpu_info().vmem_capacity_bytes)
    except Exception:
        return 128 * 1024 * 1024


def _step_vmem_bytes(block_b, S, D, hq, hv, d_hidden, h, dot_itemsize):
    """Rough per-grid-step VMEM footprint (f32 activations, single-buffered weights)."""
    f32 = 4
    rows = block_b * S
    ncol = 2 * hq + hv
    io = 2 * rows * D * f32 * 2                      # x + out blocks, double-buffered
    score_io = 2 * h * block_b * S * S * f32         # score out-block, double-buffered
    acts = 3 * rows * ncol * f32                     # qkv + folded q/k/v copies
    acts += 4 * h * block_b * S * S * f32            # score / exp / p temporaries
    acts += 2 * rows * hv * f32                      # attention output (folded + merged)
    acts += rows * d_hidden * (f32 + dot_itemsize)   # FFN hidden (+ cast copy)
    acts += 3 * rows * D * f32                       # sa / x1 / ff working copies
    weights = D * ncol * f32                         # fused W_qkv (f32, single-buffered)
    weights += (hv * D + D * d_hidden + d_hidden * D) * dot_itemsize
    weights += (ncol + 6 * D + d_hidden) * f32       # biases + LN params
    return int((io + score_io + acts + weights) * 1.2)   # fudge: compiler scratch / padding


def _choose_block_b(B, S, D, hq, hv, d_hidden, h, dot_itemsize, budget, keep_two_steps):
    divisors = [d for d in range(1, B + 1) if B % d == 0]
    fitting = [d for d in divisors
               if _step_vmem_bytes(d, S, D, hq, hv, d_hidden, h, dot_itemsize) <= budget]
    if not fitting:
        fitting = [divisors[0]]
    if keep_two_steps:                               # v7x megacore: want >=2 parallel steps
        two = [d for d in fitting if B // d >= 2]
        if two:
            fitting = two
    return fitting[-1]                               # fold as much batch as VMEM allows


def encoder_forward(x, params, h, block_b=None, dot_dtype=jnp.bfloat16):
    B, S, D = x.shape
    hq = params["wq"].shape[1]
    hv = params["wv"].shape[1]
    q_dim = hq // h
    v_dim = hv // h
    d_hidden = params["w1"].shape[1]

    dot_itemsize = 2 if dot_dtype == jnp.bfloat16 else 4

    phys_vmem = _physical_vmem_bytes()
    vmem_limit = max(32 * 1024 * 1024, min(int(phys_vmem * 0.75), 100 * 1024 * 1024))
    keep_two_steps = phys_vmem <= 64 * 1024 * 1024   # 64 MiB class == v7x (2 TCs/chip)

    if block_b is None:
        block_b = _choose_block_b(B, S, D, hq, hv, d_hidden, h,
                                  dot_itemsize, vmem_limit, keep_two_steps)
    assert B % block_b == 0

    # Fuse the three projection weights/biases into one (single MXU pass in-kernel).
    # TODO(synk): at realistic dims, pad each Q/K/V segment to a 128-lane multiple
    # so the in-kernel sub-slices stay lane-aligned.
    w_qkv = jnp.concatenate([params["wq"], params["wk"], params["wv"]], axis=1)
    b_qkv = jnp.concatenate([params["bq"], params["bk"], params["bv"]], axis=1)
    # bf16 weights for the non-score matmuls: half the DMA bytes + VMEM, native
    # MXU input on all generations; accumulation stays f32.
    wo = params["wo"].astype(dot_dtype)
    w1 = params["w1"].astype(dot_dtype)
    w2 = params["w2"].astype(dot_dtype)

    kernel = functools.partial(encoder_kernel, h, q_dim, v_dim, dot_dtype)

    def const_spec(shape):
        # Constant-index blocks are never re-DMA'd: single-buffer them to halve
        # their VMEM footprint (critical on v7x's 64 MiB).
        return pl.BlockSpec(shape, lambda b: (0, 0), pipeline_mode=pl.Buffered(1))

    in_specs = [
        pl.BlockSpec((block_b, S, D), lambda b: (b, 0, 0)),    # x: block_b batch elems / step
        const_spec((D, 2 * hq + hv)), const_spec((1, 2 * hq + hv)),   # fused W_qkv, b_qkv
        const_spec((hv, D)), const_spec((1, D)),                      # W_o, b_o
        const_spec((1, D)), const_spec((1, D)),                       # LN1 gamma, beta
        const_spec((D, d_hidden)), const_spec((1, d_hidden)),         # FF linear_1
        const_spec((d_hidden, D)), const_spec((1, D)),                # FF linear_2
        const_spec((1, D)), const_spec((1, D)),                       # LN2 gamma, beta
    ]
    out_specs = [
        pl.BlockSpec((block_b, S, D), lambda b: (b, 0, 0)),           # encoded output
        # TODO(synk): for S < 128 this score store is lane-sparse (masked vst);
        # pack the last dim to a >=128 multiple or emit bf16 scores when allowed.
        pl.BlockSpec((h, block_b, S, S), lambda b: (0, b, 0, 0)),     # scores, head-major
    ]
    out_shape = [
        jax.ShapeDtypeStruct((B, S, D), jnp.float32),
        jax.ShapeDtypeStruct((h, B, S, S), jnp.float32),
    ]

    out, score = pl.pallas_call(
        kernel,
        grid=(B // block_b,),
        in_specs=in_specs,
        out_specs=out_specs,
        out_shape=out_shape,
        compiler_params=pltpu.CompilerParams(
            dimension_semantics=("parallel",),
            vmem_limit_bytes=vmem_limit,
        ),
    )(x, w_qkv, b_qkv,
      wo, params["bo"],
      params["g1"], params["be1"],
      w1, params["b1"], w2, params["b2"],
      params["g2"], params["be2"])

    # torch.cat(chunk(..., h, dim=-1), dim=0) is head-major: index = head*B + b,
    # which is exactly a reshape of the (h, B, S, S) layout (no transpose needed).
    return out, score.reshape(h * B, S, S)


# ------------------------------ pure-JAX reference --------------------------------


def _layernorm_ref(y, gamma, beta, eps=1e-5):
    mean = jnp.mean(y, axis=-1, keepdims=True)
    var = jnp.mean((y - mean) ** 2, axis=-1, keepdims=True)   # biased var (PyTorch)
    return (y - mean) * jax.lax.rsqrt(var + eps) * gamma + beta


def encoder_reference(x, p, h):
    q_dim = p["wq"].shape[1] // h

    Q = x @ p["wq"] + p["bq"]
    K = x @ p["wk"] + p["bk"]
    V = x @ p["wv"] + p["bv"]
    Qh = jnp.concatenate(jnp.split(Q, h, axis=-1), axis=0)     # (h*B, S, q)
    Kh = jnp.concatenate(jnp.split(K, h, axis=-1), axis=0)
    Vh = jnp.concatenate(jnp.split(V, h, axis=-1), axis=0)

    score = jnp.einsum("bqd,bkd->bqk", Qh, Kh) / math.sqrt(q_dim)
    attn = jnp.einsum("bqk,bkd->bqd", jax.nn.softmax(score, axis=-1), Vh)
    attn_heads = jnp.concatenate(jnp.split(attn, h, axis=0), axis=-1)
    sa = attn_heads @ p["wo"] + p["bo"]

    x1 = _layernorm_ref(sa + x, p["g1"], p["be1"])
    ff = jnp.maximum(x1 @ p["w1"] + p["b1"], 0.0) @ p["w2"] + p["b2"]
    out = _layernorm_ref(ff + x1, p["g2"], p["be2"])
    return out, score


# ------------------------------ main ------------------------------------------------


if __name__ == "__main__":
    # Small, module-consistent shapes.
    B, S = 2, 8
    d_model, d_hidden = 32, 64
    q_dim, v_dim, h = 8, 8, 4

    key = jax.random.PRNGKey(0)
    ks = jax.random.split(key, 8)

    def lin(k, d_in, d_out):
        bound = 1.0 / math.sqrt(d_in)
        kw, kb = jax.random.split(k)
        w = jax.random.uniform(kw, (d_in, d_out), jnp.float32, -bound, bound)
        b = jax.random.uniform(kb, (1, d_out), jnp.float32, -bound, bound)
        return w, b

    wq, bq = lin(ks[0], d_model, q_dim * h)
    wk, bk = lin(ks[1], d_model, q_dim * h)
    wv, bv = lin(ks[2], d_model, v_dim * h)
    wo, bo = lin(ks[3], v_dim * h, d_model)
    w1, b1 = lin(ks[4], d_model, d_hidden)
    w2, b2 = lin(ks[5], d_hidden, d_model)

    params = dict(
        wq=wq, bq=bq, wk=wk, bk=bk, wv=wv, bv=bv, wo=wo, bo=bo,
        w1=w1, b1=b1, w2=w2, b2=b2,
        g1=jnp.ones((1, d_model), jnp.float32), be1=jnp.zeros((1, d_model), jnp.float32),
        g2=jnp.ones((1, d_model), jnp.float32), be2=jnp.zeros((1, d_model), jnp.float32),
    )

    x = jax.random.normal(ks[6], (B, S, d_model), jnp.float32)

    ref_out, ref_score = encoder_reference(x, params, h)

    # Exact path: every matmul in f32 (verifies semantics incl. fused LayerNorm).
    out32, score32 = encoder_forward(x, params, h, dot_dtype=jnp.float32)
    jax.block_until_ready((out32, score32))
    assert jnp.allclose(score32, ref_score, atol=1e-3, rtol=1e-3), "score mismatch (f32)"
    assert jnp.allclose(out32, ref_out, atol=2e-3, rtol=2e-3), "output mismatch (f32)"

    # Fast path: bf16 weight/activation matmuls (score path stays f32).
    out16, score16 = encoder_forward(x, params, h, dot_dtype=jnp.bfloat16)
    jax.block_until_ready((out16, score16))
    assert jnp.allclose(score16, ref_score, atol=1e-3, rtol=1e-3), "score mismatch (bf16)"
    assert jnp.allclose(out16, ref_out, atol=5e-2, rtol=5e-2), "output mismatch (bf16)"

    print("KERNEL_OK")
</pallas_src>

<mosaic_0001>
module attributes {stable_mosaic.version = 11 : i64} {
  func.func @encoder_kernel(%arg0: i32, %arg1: memref<2x8x32xf32, #tpu.memory_space<vmem>>, %arg2: memref<32x96xf32, #tpu.memory_space<vmem>>, %arg3: memref<1x96xf32, #tpu.memory_space<vmem>>, %arg4: memref<32x32xf32, #tpu.memory_space<vmem>>, %arg5: memref<1x32xf32, #tpu.memory_space<vmem>>, %arg6: memref<1x32xf32, #tpu.memory_space<vmem>>, %arg7: memref<1x32xf32, #tpu.memory_space<vmem>>, %arg8: memref<32x64xf32, #tpu.memory_space<vmem>>, %arg9: memref<1x64xf32, #tpu.memory_space<vmem>>, %arg10: memref<64x32xf32, #tpu.memory_space<vmem>>, %arg11: memref<1x32xf32, #tpu.memory_space<vmem>>, %arg12: memref<1x32xf32, #tpu.memory_space<vmem>>, %arg13: memref<1x32xf32, #tpu.memory_space<vmem>>, %arg14: memref<2x8x32xf32, #tpu.memory_space<vmem>>, %arg15: memref<4x2x8x8xf32, #tpu.memory_space<vmem>>) attributes {dimension_semantics = [#tpu.dimension_semantics<parallel>], iteration_bounds = array<i64: 1>, scalar_prefetch = 0 : i64, scratch_operands = 0 : i64, tpu.core_type = #tpu.core_type<tc>, window_params = [{transform_indices = @transform_0, window_bounds = array<i64: 2, 8, 32>}, {pipeline_mode = #tpu.pipeline_mode<synchronous>, transform_indices = @transform_1, window_bounds = array<i64: 32, 96>}, {pipeline_mode = #tpu.pipeline_mode<synchronous>, transform_indices = @transform_2, window_bounds = array<i64: 1, 96>}, {pipeline_mode = #tpu.pipeline_mode<synchronous>, transform_indices = @transform_3, window_bounds = array<i64: 32, 32>}, {pipeline_mode = #tpu.pipeline_mode<synchronous>, transform_indices = @transform_4, window_bounds = array<i64: 1, 32>}, {pipeline_mode = #tpu.pipeline_mode<synchronous>, transform_indices = @transform_5, window_bounds = array<i64: 1, 32>}, {pipeline_mode = #tpu.pipeline_mode<synchronous>, transform_indices = @transform_6, window_bounds = array<i64: 1, 32>}, {pipeline_mode = #tpu.pipeline_mode<synchronous>, transform_indices = @transform_7, window_bounds = array<i64: 32, 64>}, {pipeline_mode = #tpu.pipeline_mode<synchronous>, transform_indices = @transform_8, window_bounds = array<i64: 1, 64>}, {pipeline_mode = #tpu.pipeline_mode<synchronous>, transform_indices = @transform_9, window_bounds = array<i64: 64, 32>}, {pipeline_mode = #tpu.pipeline_mode<synchronous>, transform_indices = @transform_10, window_bounds = array<i64: 1, 32>}, {pipeline_mode = #tpu.pipeline_mode<synchronous>, transform_indices = @transform_11, window_bounds = array<i64: 1, 32>}, {pipeline_mode = #tpu.pipeline_mode<synchronous>, transform_indices = @transform_12, window_bounds = array<i64: 1, 32>}, {transform_indices = @transform_13, window_bounds = array<i64: 2, 8, 32>}, {transform_indices = @transform_14, window_bounds = array<i64: 4, 2, 8, 8>}]} {
    %c0 = arith.constant 0 : index
    %c0_0 = arith.constant 0 : index
    %c0_1 = arith.constant 0 : index
    %0 = vector.load %arg1[%c0, %c0_0, %c0_1] : memref<2x8x32xf32, #tpu.memory_space<vmem>>, vector<2x8x32xf32>
    %1 = vector.shape_cast %0 : vector<2x8x32xf32> to vector<16x32xf32>
    %c0_2 = arith.constant 0 : index
    %c0_3 = arith.constant 0 : index
    %2 = vector.load %arg2[%c0_2, %c0_3] : memref<32x96xf32, #tpu.memory_space<vmem>>, vector<32x96xf32>
    %cst = arith.constant dense<0.000000e+00> : vector<16x96xf32>
    %3 = tpu.matmul %1, %2, %cst {dimension_numbers = #tpu.dot_dimension_numbers<[1], [0], [0], [1], [0, 0, 1, 1], [], []>} : vector<16x32xf32>, vector<32x96xf32>, vector<16x96xf32> -> vector<16x96xf32>
    %c0_4 = arith.constant 0 : index
    %c0_5 = arith.constant 0 : index
    %4 = vector.load %arg3[%c0_4, %c0_5] : memref<1x96xf32, #tpu.memory_space<vmem>>, vector<1x96xf32>
    %5 = vector.broadcast %4 : vector<1x96xf32> to vector<16x96xf32>
    %6 = arith.addf %3, %5 : vector<16x96xf32>
    %7 = vector.extract_strided_slice %6 {offsets = [0, 0], sizes = [16, 32], strides = [1, 1]} : vector<16x96xf32> to vector<16x32xf32>
    %cst_6 = arith.constant 0.353553385 : f32
    %8 = vector.broadcast %cst_6 : f32 to vector<16x32xf32>
    %9 = arith.mulf %7, %8 : vector<16x32xf32>
    %10 = vector.shape_cast %9 : vector<16x32xf32> to vector<2x8x4x8xf32>
    %11 = tpu.transpose %10, [2, 0, 1, 3] : vector<2x8x4x8xf32> -> vector<4x2x8x8xf32>
    %12 = vector.shape_cast %11 : vector<4x2x8x8xf32> to vector<8x8x8xf32>
    %13 = vector.extract_strided_slice %6 {offsets = [0, 32], sizes = [16, 32], strides = [1, 1]} : vector<16x96xf32> to vector<16x32xf32>
    %14 = vector.shape_cast %13 : vector<16x32xf32> to vector<2x8x4x8xf32>
    %15 = tpu.transpose %14, [2, 0, 1, 3] : vector<2x8x4x8xf32> -> vector<4x2x8x8xf32>
    %16 = vector.shape_cast %15 : vector<4x2x8x8xf32> to vector<8x8x8xf32>
    %17 = vector.extract_strided_slice %6 {offsets = [0, 64], sizes = [16, 32], strides = [1, 1]} : vector<16x96xf32> to vector<16x32xf32>
    %18 = vector.shape_cast %17 : vector<16x32xf32> to vector<2x8x4x8xf32>
    %19 = tpu.transpose %18, [2, 0, 1, 3] : vector<2x8x4x8xf32> -> vector<4x2x8x8xf32>
    %20 = vector.shape_cast %19 : vector<4x2x8x8xf32> to vector<8x8x8xf32>
    "tpu.trace_start"() <{level = 10 : i32, message = "bsq,bkq->bsk"}> : () -> ()
    %cst_7 = arith.constant dense<0.000000e+00> : vector<8x8x8xf32>
    %21 = tpu.matmul %12, %16, %cst_7 {dimension_numbers = #tpu.dot_dimension_numbers<[2], [2], [1], [1], [0, 0, 0, 1, 1, 1], [0], [0]>} : vector<8x8x8xf32>, vector<8x8x8xf32>, vector<8x8x8xf32> -> vector<8x8x8xf32>
    "tpu.trace_stop"() : () -> ()
    %22 = vector.shape_cast %21 : vector<8x8x8xf32> to vector<4x2x8x8xf32>
    %c0_8 = arith.constant 0 : index
    %c0_9 = arith.constant 0 : index
    %c0_10 = arith.constant 0 : index
    %c0_11 = arith.constant 0 : index
    %23 = vector.load %arg15[%c0_8, %c0_9, %c0_10, %c0_11] : memref<4x2x8x8xf32, #tpu.memory_space<vmem>>, vector<4x2x8x8xf32>
    tpu.vector_store %arg15[%c0_8, %c0_9, %c0_10, %c0_11], %22 {strides = array<i32>} : memref<4x2x8x8xf32, #tpu.memory_space<vmem>>, vector<4x2x8x8xf32>,
    %cst_12 = arith.constant dense<0xFF800000> : vector<8x8xf32>
    %24 = vector.multi_reduction <maximumf>, %21, %cst_12 [2] : vector<8x8x8xf32> to vector<8x8xf32>
    %25 = vector.shape_cast %24 : vector<8x8xf32> to vector<8x8x1xf32>
    %26 = vector.broadcast %25 : vector<8x8x1xf32> to vector<8x8x8xf32>
    %27 = arith.subf %21, %26 : vector<8x8x8xf32>
    %28 = math.exp %27 : vector<8x8x8xf32>
    %cst_13 = arith.constant dense<0.000000e+00> : vector<8x8xf32>
    %29 = vector.multi_reduction <add>, %28, %cst_13 [2] : vector<8x8x8xf32> to vector<8x8xf32>
    %30 = vector.shape_cast %29 : vector<8x8xf32> to vector<8x8x1xf32>
    %31 = tpu.reciprocal %30 {approx = true} : vector<8x8x1xf32> -> vector<8x8x1xf32>
    %32 = arith.mulf %30, %31 : vector<8x8x1xf32>
    %cst_14 = arith.constant 2.000000e+00 : f32
    %33 = vector.broadcast %cst_14 : f32 to vector<8x8x1xf32>
    %34 = arith.subf %33, %32 : vector<8x8x1xf32>
    %35 = arith.mulf %31, %34 : vector<8x8x1xf32>
    %36 = vector.broadcast %35 : vector<8x8x1xf32> to vector<8x8x8xf32>
    %37 = arith.mulf %28, %36 : vector<8x8x8xf32>
    "tpu.trace_start"() <{level = 10 : i32, message = "bsk,bkv->bsv"}> : () -> ()
    %cst_15 = arith.constant dense<0.000000e+00> : vector<8x8x8xf32>
    %38 = tpu.matmul %37, %20, %cst_15 {dimension_numbers = #tpu.dot_dimension_numbers<[2], [1], [1], [2], [0, 0, 0, 1, 1, 2], [0], [0]>} : vector<8x8x8xf32>, vector<8x8x8xf32>, vector<8x8x8xf32> -> vector<8x8x8xf32>
    "tpu.trace_stop"() : () -> ()
    %39 = vector.shape_cast %38 : vector<8x8x8xf32> to vector<4x2x8x8xf32>
    %40 = tpu.transpose %39, [1, 2, 0, 3] : vector<4x2x8x8xf32> -> vector<2x8x4x8xf32>
    %41 = vector.shape_cast %40 : vector<2x8x4x8xf32> to vector<16x32xf32>
    %c0_16 = arith.constant 0 : index
    %c0_17 = arith.constant 0 : index
    %42 = vector.load %arg4[%c0_16, %c0_17] : memref<32x32xf32, #tpu.memory_space<vmem>>, vector<32x32xf32>
    %cst_18 = arith.constant dense<0.000000e+00> : vector<16x32xf32>
    %43 = tpu.matmul %41, %42, %cst_18 {dimension_numbers = #tpu.dot_dimension_numbers<[1], [0], [0], [1], [0, 0, 1, 1], [], []>} : vector<16x32xf32>, vector<32x32xf32>, vector<16x32xf32> -> vector<16x32xf32>
    %c0_19 = arith.constant 0 : index
    %c0_20 = arith.constant 0 : index
    %44 = vector.load %arg5[%c0_19, %c0_20] : memref<1x32xf32, #tpu.memory_space<vmem>>, vector<1x32xf32>
    %45 = vector.broadcast %44 : vector<1x32xf32> to vector<16x32xf32>
    %46 = arith.addf %43, %45 : vector<16x32xf32>
    %47 = arith.addf %46, %1 : vector<16x32xf32>
    %c0_21 = arith.constant 0 : index
    %c0_22 = arith.constant 0 : index
    %48 = vector.load %arg6[%c0_21, %c0_22] : memref<1x32xf32, #tpu.memory_space<vmem>>, vector<1x32xf32>
    %c0_23 = arith.constant 0 : index
    %c0_24 = arith.constant 0 : index
    %49 = vector.load %arg7[%c0_23, %c0_24] : memref<1x32xf32, #tpu.memory_space<vmem>>, vector<1x32xf32>
    %cst_25 = arith.constant dense<0.000000e+00> : vector<16xf32>
    %50 = vector.multi_reduction <add>, %47, %cst_25 [1] : vector<16x32xf32> to vector<16xf32>
    %51 = vector.shape_cast %50 : vector<16xf32> to vector<16x1xf32>
    %cst_26 = arith.constant 3.200000e+01 : f32
    %52 = vector.broadcast %cst_26 : f32 to vector<16x1xf32>
    %53 = arith.divf %51, %52 : vector<16x1xf32>
    %54 = arith.mulf %47, %47 : vector<16x32xf32>
    %cst_27 = arith.constant dense<0.000000e+00> : vector<16xf32>
    %55 = vector.multi_reduction <add>, %54, %cst_27 [1] : vector<16x32xf32> to vector<16xf32>
    %56 = vector.shape_cast %55 : vector<16xf32> to vector<16x1xf32>
    %cst_28 = arith.constant 3.200000e+01 : f32
    %57 = vector.broadcast %cst_28 : f32 to vector<16x1xf32>
    %58 = arith.divf %56, %57 : vector<16x1xf32>
    %59 = arith.mulf %53, %53 : vector<16x1xf32>
    %60 = arith.subf %58, %59 : vector<16x1xf32>
    %cst_29 = arith.constant 0.000000e+00 : f32
    %61 = vector.broadcast %cst_29 : f32 to vector<16x1xf32>
    %62 = arith.maximumf %60, %61 : vector<16x1xf32>
    %63 = vector.broadcast %53 : vector<16x1xf32> to vector<16x32xf32>
    %64 = arith.subf %47, %63 : vector<16x32xf32>
    %cst_30 = arith.constant 9.99999974E-6 : f32
    %65 = vector.broadcast %cst_30 : f32 to vector<16x1xf32>
    %66 = arith.addf %62, %65 : vector<16x1xf32>
    %67 = math.rsqrt %66 : vector<16x1xf32>
    %68 = vector.broadcast %67 : vector<16x1xf32> to vector<16x32xf32>
    %69 = arith.mulf %64, %68 : vector<16x32xf32>
    %70 = vector.broadcast %48 : vector<1x32xf32> to vector<16x32xf32>
    %71 = arith.mulf %69, %70 : vector<16x32xf32>
    %72 = vector.broadcast %49 : vector<1x32xf32> to vector<16x32xf32>
    %73 = arith.addf %71, %72 : vector<16x32xf32>
    %c0_31 = arith.constant 0 : index
    %c0_32 = arith.constant 0 : index
    %74 = vector.load %arg8[%c0_31, %c0_32] : memref<32x64xf32, #tpu.memory_space<vmem>>, vector<32x64xf32>
    %cst_33 = arith.constant dense<0.000000e+00> : vector<16x64xf32>
    %75 = tpu.matmul %73, %74, %cst_33 {dimension_numbers = #tpu.dot_dimension_numbers<[1], [0], [0], [1], [0, 0, 1, 1], [], []>} : vector<16x32xf32>, vector<32x64xf32>, vector<16x64xf32> -> vector<16x64xf32>
    %c0_34 = arith.constant 0 : index
    %c0_35 = arith.constant 0 : index
    %76 = vector.load %arg9[%c0_34, %c0_35] : memref<1x64xf32, #tpu.memory_space<vmem>>, vector<1x64xf32>
    %77 = vector.broadcast %76 : vector<1x64xf32> to vector<16x64xf32>
    %78 = arith.addf %75, %77 : vector<16x64xf32>
    %cst_36 = arith.constant 0.000000e+00 : f32
    %79 = vector.broadcast %cst_36 : f32 to vector<16x64xf32>
    %80 = arith.maximumf %78, %79 : vector<16x64xf32>
    %c0_37 = arith.constant 0 : index
    %c0_38 = arith.constant 0 : index
    %81 = vector.load %arg10[%c0_37, %c0_38] : memref<64x32xf32, #tpu.memory_space<vmem>>, vector<64x32xf32>
    %cst_39 = arith.constant dense<0.000000e+00> : vector<16x32xf32>
    %82 = tpu.matmul %80, %81, %cst_39 {dimension_numbers = #tpu.dot_dimension_numbers<[1], [0], [0], [1], [0, 0, 1, 1], [], []>} : vector<16x64xf32>, vector<64x32xf32>, vector<16x32xf32> -> vector<16x32xf32>
    %c0_40 = arith.constant 0 : index
    %c0_41 = arith.constant 0 : index
    %83 = vector.load %arg11[%c0_40, %c0_41] : memref<1x32xf32, #tpu.memory_space<vmem>>, vector<1x32xf32>
    %84 = vector.broadcast %83 : vector<1x32xf32> to vector<16x32xf32>
    %85 = arith.addf %82, %84 : vector<16x32xf32>
    %86 = arith.addf %85, %73 : vector<16x32xf32>
    %c0_42 = arith.constant 0 : index
    %c0_43 = arith.constant 0 : index
    %87 = vector.load %arg12[%c0_42, %c0_43] : memref<1x32xf32, #tpu.memory_space<vmem>>, vector<1x32xf32>
    %c0_44 = arith.constant 0 : index
    %c0_45 = arith.constant 0 : index
    %88 = vector.load %arg13[%c0_44, %c0_45] : memref<1x32xf32, #tpu.memory_space<vmem>>, vector<1x32xf32>
    %cst_46 = arith.constant dense<0.000000e+00> : vector<16xf32>
    %89 = vector.multi_reduction <add>, %86, %cst_46 [1] : vector<16x32xf32> to vector<16xf32>
    %90 = vector.shape_cast %89 : vector<16xf32> to vector<16x1xf32>
    %cst_47 = arith.constant 3.200000e+01 : f32
    %91 = vector.broadcast %cst_47 : f32 to vector<16x1xf32>
    %92 = arith.divf %90, %91 : vector<16x1xf32>
    %93 = arith.mulf %86, %86 : vector<16x32xf32>
    %cst_48 = arith.constant dense<0.000000e+00> : vector<16xf32>
    %94 = vector.multi_reduction <add>, %93, %cst_48 [1] : vector<16x32xf32> to vector<16xf32>
    %95 = vector.shape_cast %94 : vector<16xf32> to vector<16x1xf32>
    %cst_49 = arith.constant 3.200000e+01 : f32
    %96 = vector.broadcast %cst_49 : f32 to vector<16x1xf32>
    %97 = arith.divf %95, %96 : vector<16x1xf32>
    %98 = arith.mulf %92, %92 : vector<16x1xf32>
    %99 = arith.subf %97, %98 : vector<16x1xf32>
    %cst_50 = arith.constant 0.000000e+00 : f32
    %100 = vector.broadcast %cst_50 : f32 to vector<16x1xf32>
    %101 = arith.maximumf %99, %100 : vector<16x1xf32>
    %102 = vector.broadcast %92 : vector<16x1xf32> to vector<16x32xf32>
    %103 = arith.subf %86, %102 : vector<16x32xf32>
    %cst_51 = arith.constant 9.99999974E-6 : f32
    %104 = vector.broadcast %cst_51 : f32 to vector<16x1xf32>
    %105 = arith.addf %101, %104 : vector<16x1xf32>
    %106 = math.rsqrt %105 : vector<16x1xf32>
    %107 = vector.broadcast %106 : vector<16x1xf32> to vector<16x32xf32>
    %108 = arith.mulf %103, %107 : vector<16x32xf32>
    %109 = vector.broadcast %87 : vector<1x32xf32> to vector<16x32xf32>
    %110 = arith.mulf %108, %109 : vector<16x32xf32>
    %111 = vector.broadcast %88 : vector<1x32xf32> to vector<16x32xf32>
    %112 = arith.addf %110, %111 : vector<16x32xf32>
    %113 = vector.shape_cast %112 : vector<16x32xf32> to vector<2x8x32xf32>
    %c0_52 = arith.constant 0 : index
    %c0_53 = arith.constant 0 : index
    %c0_54 = arith.constant 0 : index
    %114 = vector.load %arg14[%c0_52, %c0_53, %c0_54] : memref<2x8x32xf32, #tpu.memory_space<vmem>>, vector<2x8x32xf32>
    tpu.vector_store %arg14[%c0_52, %c0_53, %c0_54], %113 {strides = array<i32>} : memref<2x8x32xf32, #tpu.memory_space<vmem>>, vector<2x8x32xf32>,
    return
  }
  func.func @transform_0(%arg0: i32) -> (i32, i32, i32) {
    %c0_i32 = arith.constant 0 : i32
    %c0_i32_0 = arith.constant 0 : i32
    %c0_i32_1 = arith.constant 0 : i32
    return %arg0, %c0_i32, %c0_i32_0 : i32, i32, i32
  }
  func.func @transform_1(%arg0: i32) -> (i32, i32) {
    %c0_i32 = arith.constant 0 : i32
    %c0_i32_0 = arith.constant 0 : i32
    %c0_i32_1 = arith.constant 0 : i32
    return %c0_i32, %c0_i32_0 : i32, i32
  }
  func.func @transform_2(%arg0: i32) -> (i32, i32) {
    %c0_i32 = arith.constant 0 : i32
    %c0_i32_0 = arith.constant 0 : i32
    %c0_i32_1 = arith.constant 0 : i32
    return %c0_i32, %c0_i32_0 : i32, i32
  }
  func.func @transform_3(%arg0: i32) -> (i32, i32) {
    %c0_i32 = arith.constant 0 : i32
    %c0_i32_0 = arith.constant 0 : i32
    %c0_i32_1 = arith.constant 0 : i32
    return %c0_i32, %c0_i32_0 : i32, i32
  }
  func.func @transform_4(%arg0: i32) -> (i32, i32) {
    %c0_i32 = arith.constant 0 : i32
    %c0_i32_0 = arith.constant 0 : i32
    %c0_i32_1 = arith.constant 0 : i32
    return %c0_i32, %c0_i32_0 : i32, i32
  }
  func.func @transform_5(%arg0: i32) -> (i32, i32) {
    %c0_i32 = arith.constant 0 : i32
    %c0_i32_0 = arith.constant 0 : i32
    %c0_i32_1 = arith.constant 0 : i32
    return %c0_i32, %c0_i32_0 : i32, i32
  }
  func.func @transform_6(%arg0: i32) -> (i32, i32) {
    %c0_i32 = arith.constant 0 : i32
    %c0_i32_0 = arith.constant 0 : i32
    %c0_i32_1 = arith.constant 0 : i32
    return %c0_i32, %c0_i32_0 : i32, i32
  }
  func.func @transform_7(%arg0: i32) -> (i32, i32) {
    %c0_i32 = arith.constant 0 : i32
    %c0_i32_0 = arith.constant 0 : i32
    %c0_i32_1 = arith.constant 0 : i32
    return %c0_i32, %c0_i32_0 : i32, i32
  }
  func.func @transform_8(%arg0: i32) -> (i32, i32) {
    %c0_i32 = arith.constant 0 : i32
    %c0_i32_0 = arith.constant 0 : i32
    %c0_i32_1 = arith.constant 0 : i32
    return %c0_i32, %c0_i32_0 : i32, i32
  }
  func.func @transform_9(%arg0: i32) -> (i32, i32) {
    %c0_i32 = arith.constant 0 : i32
    %c0_i32_0 = arith.constant 0 : i32
    %c0_i32_1 = arith.constant 0 : i32
    return %c0_i32, %c0_i32_0 : i32, i32
  }
  func.func @transform_10(%arg0: i32) -> (i32, i32) {
    %c0_i32 = arith.constant 0 : i32
    %c0_i32_0 = arith.constant 0 : i32
    %c0_i32_1 = arith.constant 0 : i32
    return %c0_i32, %c0_i32_0 : i32, i32
  }
  func.func @transform_11(%arg0: i32) -> (i32, i32) {
    %c0_i32 = arith.constant 0 : i32
    %c0_i32_0 = arith.constant 0 : i32
    %c0_i32_1 = arith.constant 0 : i32
    return %c0_i32, %c0_i32_0 : i32, i32
  }
  func.func @transform_12(%arg0: i32) -> (i32, i32) {
    %c0_i32 = arith.constant 0 : i32
    %c0_i32_0 = arith.constant 0 : i32
    %c0_i32_1 = arith.constant 0 : i32
    return %c0_i32, %c0_i32_0 : i32, i32
  }
  func.func @transform_13(%arg0: i32) -> (i32, i32, i32) {
    %c0_i32 = arith.constant 0 : i32
    %c0_i32_0 = arith.constant 0 : i32
    %c0_i32_1 = arith.constant 0 : i32
    return %arg0, %c0_i32, %c0_i32_0 : i32, i32, i32
  }
  func.func @transform_14(%arg0: i32) -> (i32, i32, i32, i32) {
    %c0_i32 = arith.constant 0 : i32
    %c0_i32_0 = arith.constant 0 : i32
    %c0_i32_1 = arith.constant 0 : i32
    %c0_i32_2 = arith.constant 0 : i32
    return %c0_i32, %arg0, %c0_i32_0, %c0_i32_1 : i32, i32, i32, i32
  }
}

</mosaic_0001>

<bundles_post_ra>
// kernel: tpu_custom_call.1
= control target key start
LH: loop header
LB: loop body
LE: loop exit
PB: predicated region body
PF: predicated region fallthrough
CT: control target
= control target key end

     0   :  { %20 = vsyncpa [#allocation3], 0  ;;  %s2828_s0 = inlined_call_operand.hbm [shape: f32[2,8,32], index: 0, kind: input, shape index: {}]   ;;  %s2829_s1 = inlined_call_operand.vmem [shape: f32[32,96], index: 1, kind: input, shape index: {}]   ;;  %s2830_s2 = inlined_call_operand.vmem [shape: f32[1,96], index: 2, kind: input, shape index: {}]   ;;  %s2831_s3 = inlined_call_operand.vmem [shape: f32[32,32], index: 3, kind: input, shape index: {}]   ;;  %s2832_s4 = inlined_call_operand.vmem [shape: f32[1,32], index: 4, kind: input, shape index: {}]   ;;  %s2833_s5 = inlined_call_operand.vmem [shape: f32[1,32], index: 5, kind: input, shape index: {}]   ;;  %s2834_s6 = inlined_call_operand.vmem [shape: f32[1,32], index: 6, kind: input, shape index: {}]   ;;  %s2835_s7 = inlined_call_operand.vmem [shape: f32[32,64], index: 7, kind: input, shape index: {}]   ;;  %s2836_s8 = inlined_call_operand.vmem [shape: f32[1,64], index: 8, kind: input, shape index: {}]   ;;  %s2837_s9 = inlined_call_operand.vmem [shape: f32[64,32], index: 9, kind: input, shape index: {}]   ;;  %s2838_s10 = inlined_call_operand.vmem [shape: f32[1,32], index: 10, kind: input, shape index: {}]   ;;  %s2839_s11 = inlined_call_operand.vmem [shape: f32[1,32], index: 11, kind: input, shape index: {}]   ;;  %s2840_s12 = inlined_call_operand.vmem [shape: f32[1,32], index: 12, kind: input, shape index: {}]   ;;  %s2841_s13 = inlined_call_operand.hbm [shape: f32[2,8,32], index: 13, kind: output, shape index: {0}]   ;;  %s2842_s14 = inlined_call_operand.hbm [shape: f32[4,2,8,8], index: 14, kind: output, shape index: {1}]  }
   0x1   :  { %21 = vsyncpa [#allocation4], 0 }
   0x2   :  { %22 = vsyncpa [#allocation7], 0  ;;  %s27_s15 = sshll.u32 %s2828_s0, 4  ;;  %s2103_s16 = smov [#allocation2]   ;;  %s28_s15 = int_to_ptr.hbm [resolvable:$true] %s27_s15 }
   0x3   :  { %s29_s17 = sshll.u32 %s2103_s16, 4  ;;  %s2104_s18 = smov 128   ;;  %s30_s17 = int_to_ptr.vmem [resolvable:$true] %s29_s17 }
   0x4   :  { %s2105_s19 = smov 8  }
   0x5   :  { %35 = dma.hbm_to_vmem [thread:$0]  %s28_s15, 256, %s30_s17, [#allocation3], %s2104_s18, %s2104_s18, %s2105_s19  }
   0x6   :  { %2097 = dma.done.wait [#allocation3], 256  }
   0x7   :  { %2098 = vsyncadd [#allocation3], 4294967040  ;;  %v69_v0 = vld [vmem:[%s2829_s1 + $0x18] sm:$0xff]  ;;  %v68_v1 = vld [vmem:[%s2829_s1 + $0x10] sm:$0xff]  ;;  %vm74_vm0 = vcmask 261120   ;;  %s2106_s29 = smov 104  }
   0x8   :  { %93 = vmatpush.msra.mxu0 %v69_v0  ;;  %v67_v2 = vld [vmem:[%s2829_s1 + $0x8] sm:$0xff]  ;;  %v66_v3 = vld [vmem:[%s2829_s1] sm:$0xff]  ;;  %s2107_s1 = smov 120   ;;  %s2108_s30 = smov 112   ;;  %v2111_v23 = vmov 1983009808  }
   0x9   :  { %v64_v4 = vld [vmem:[#allocation2] sm:$0xff]  ;;  %v65_v5 = vld [vmem:[#allocation2 + $0x8] sm:$0xff]  ;;  %s2110_s15 = smov 64   ;;  %v132_v24 = vunpack.c.l.s4 %v2111_v23  ;;  %vm127_vm1 = vcmask 1047556   ;;  %v2112_v38 = vmov 1934713408  }
   0xa   :  { %94 = vmatpush.msra.mxu0 %v68_v1  ;;  %v1973_v6 = vld [vmem:[%s2830_s2] ss:$0 sm:$0xff]  ;;  %s2109_s2 = smov 96   ;;  %v156_v39 = vunpack.c.l.s4 %v2112_v38  ;;  %vm849_vm2 = vcmask 64512   ;;  %s2113_s16 = smov 24   ;;  %vm1608_vm3 = vcmask 130048  }
   0xb   :  { %v2258_v29 = vunpack.c.0.s8 %v132_v24  ;;  %s2114_s17 = smov 16   ;;  %vm1611_vm4 = vcmask 195584   ;;  %vm1773_vm12 = vcmask 523264   ;;  %s1888_s22 = sshll.u32 %s2842_s14, 4  ;;  %s1889_s22 = int_to_ptr.hbm [resolvable:$true] %s1888_s22 }
   0xc   :  { %95 = vmatpush.msra.mxu0 %v67_v2  ;;  %v2268_v44 = vunpack.c.0.s8 %v156_v39 }
   0xe   :  { %96 = vmatpush.msra.mxu0 %v66_v3 }
   0xf   :  { %1906 = vmatmul.msk.f32.vlgmr.msra.gmra.mxu0 %vm74_vm0, %v64_v4 }
  0x17   :  { %1907 = vmatmul.msk.f32.gmra.mxu0 %vm74_vm0, %v65_v5 }
  0x8c   :  { %v98_v7 = vpop.f32.mrf.mxu0 }
  0x8d   :  { %v2216_v8 = vadd.f32 %v1973_v6, %v98_v7 }
  0x8f   :  { %357 = vrot.lane.b32.xlu1 %v2216_v8, %s2106_s29  ;;  %349 = vrot.lane.b32.xlu0 %v2216_v8, %s2107_s1  ;;  %v104_v11 = vmul.f32 0.35355338, %v2216_v8 }
  0x91   :  { %v129_v28 = vrot.slane %v104_v11, 4 }
  0x94   :  { %v101_v9 = vpop.f32.mrf.mxu0 }
  0x95   :  { %v2222_v10 = vadd.f32 %v1973_v6, %v101_v9 }
  0x97   :  { %355 = vrot.lane.b32.xlu2 %v2222_v10, %s2108_s30  ;;  %351 = vrot.lane.b32.xlu1 %v2222_v10, %s2107_s1  ;;  %v2249_v19 = vmul.f32 0.35355338, %v2222_v10 }
  0x98   :  { %353 = vrot.lane.b32.xlu0 %v2216_v8, %s2108_s30 }
  0x9f   :  { %359 = vrot.lane.b32.xlu2 %v2222_v10, %s2106_s29  ;;  %108 = vrot.lane.b32.xlu1 %v104_v11, %s2107_s1 }
  0xa0   :  { %361 = vrot.lane.b32.xlu0 %v2216_v8, %s2109_s2 }
  0xa7   :  { %114 = vrot.lane.b32.xlu2 %v104_v11, %s2108_s30  ;;  %363 = vrot.lane.b32.xlu1 %v2222_v10, %s2109_s2 }
  0xa8   :  { %120 = vrot.lane.b32.xlu0 %v104_v11, %s2106_s29 }
  0xf1   :  { %v2235_v12 = vpop.permute.xlu2 %355 }
  0xf9   :  { %v2240_v15 = vpop.permute.xlu2 %359 }
 0x101   :  { %v358_v13 = vpop.permute.xlu1 %357  ;;  %v2237_v14 = vpop.permute.xlu0 %349 }
 0x102   :  { %373 = vrot.lane.b32.xlu0 %v358_v13, %s2109_s2  ;;  %365 = vrot.lane.b32.xlu1 %v2237_v14, %s2109_s2  ;;  %v115_v22 = vpop.permute.xlu2 %114 }
 0x103   :  { %v126_v26 = vrot.slane %v115_v22, 4  ;;  %v130_v31 = vsel %vm127_vm1, %v115_v22, %v129_v28 }
 0x104   :  { %v138_v35 = vperm.slane %v130_v31, %v2258_v29 }
 0x105   :  { %v128_v33 = vsel %vm127_vm1, %v126_v26, %v104_v11 }
 0x106   :  { %v134_v37 = vperm.slane %v128_v33, %v2258_v29  ;;  %v165_v42 = vrot.slane %v138_v35, 4 }
 0x108   :  { %v153_v43 = vrot.slane %v134_v37, 4 }
 0x109   :  { %v2242_v16 = vpop.permute.xlu1 %351 }
 0x10a   :  { %v1968_v17 = vpack.i.bf16 %v2242_v16, %v2240_v15  ;;  %v354_v18 = vpop.permute.xlu0 %353  ;;  %371 = vrot.lane.b32.xlu0 %v2235_v12, %s2109_s2  ;;  %375 = vrot.lane.b32.xlu1 %v2240_v15, %s2109_s2 }
 0x10b   :  { %369 = vrot.lane.b32.xlu2 %v354_v18, %s2109_s2  ;;  %v1958_v20 = vpack.i.bf16 %v358_v13, %v354_v18 }
 0x111   :  { %v109_v27 = vpop.permute.xlu1 %108 }
 0x112   :  { %116 = vrot.lane.b32.xlu0 %v2249_v19, %s2108_s30  ;;  %122 = vrot.lane.b32.xlu1 %v2249_v19, %s2106_s29  ;;  %v362_v21 = vpop.permute.xlu0 %361  ;;  %v141_v32 = vrot.slane %v109_v27, 4 }
 0x113   :  { %367 = vrot.lane.b32.xlu2 %v2242_v16, %s2109_s2  ;;  %v387_v7 = vrot.slane %v362_v21, 4 }
 0x119   :  { %v364_v3 = vpop.permute.xlu1 %363 }
 0x11a   :  { %1959 = vrot.lane.b32.xlu1 %v1958_v20, %s2110_s15  ;;  %v121_v25 = vpop.permute.xlu0 %120 }
 0x11b   :  { %110 = vrot.lane.b32.xlu2 %v2249_v19, %s2107_s1  ;;  %v139_v30 = vrot.slane %v121_v25, 4  ;;  %v142_v34 = vsel %vm127_vm1, %v121_v25, %v141_v32 }
 0x11c   :  { %v150_v40 = vperm.slane %v142_v34, %v2258_v29 }
 0x11d   :  { %v140_v36 = vsel %vm127_vm1, %v139_v30, %v109_v27 }
 0x11e   :  { %v146_v41 = vperm.slane %v140_v36, %v2258_v29  ;;  %v163_v45 = vrot.slane %v150_v40, 4  ;;  %v166_v46 = vsel %vm127_vm1, %v150_v40, %v165_v42 }
 0x11f   :  { %v174_v49 = vperm.slane %v166_v46, %v2268_v44  ;;  %v443_v46 = vrot.slane %v364_v3, 4 }
 0x120   :  { %v151_v47 = vrot.slane %v146_v41, 4  ;;  %v154_v48 = vsel %vm127_vm1, %v146_v41, %v153_v43  ;;  %v164_v51 = vsel %vm127_vm1, %v163_v45, %v138_v35 }
 0x121   :  { %v162_v50 = vperm.slane %v154_v48, %v2268_v44  ;;  %v170_v53 = vperm.slane %v164_v51, %v2268_v44  ;;  %v181_v54 = vrot.slane %v174_v49, 4 }
 0x122   :  { %v152_v52 = vsel %vm127_vm1, %v151_v47, %v134_v37 }
 0x123   :  { %v158_v55 = vperm.slane %v152_v52, %v2268_v44  ;;  %v177_v56 = vrot.slane %v162_v50, 4  ;;  %v179_v57 = vrot.slane %v170_v53, 4  ;;  %v182_v58 = vsel %vm127_vm1, 0.0, %v181_v54 }
 0x124   :  { %v255_v61 = vrot.slane %v182_v58, 4  ;;  %v250_v11 = vsel %vm127_vm1, %v181_v54, %v170_v53  ;;  %v185_v58 = vrot.slane %v2249_v19, 4 }
 0x125   :  { %v175_v59 = vrot.slane %v158_v55, 4  ;;  %v178_v60 = vsel %vm127_vm1, 0.0, %v177_v56  ;;  %v180_v62 = vsel %vm127_vm1, 0.0, %v179_v57  ;;  %v239_v20 = vsel %vm127_vm1, %v177_v56, %v158_v55 }
 0x126   :  { %v244_v63 = vrot.slane %v178_v60, 4  ;;  %v256_v2 = vsel %vm127_vm1, %v255_v61, %v180_v62  ;;  %v2299_v28 = vperm.slane %v250_v11, %v2258_v29 }
 0x127   :  { %v176_v0 = vsel %vm127_vm1, 0.0, %v175_v59  ;;  %v2285_v6 = vperm.slane %v256_v2, %v2258_v29 }
 0x128   :  { %v245_v4 = vsel %vm127_vm1, %v244_v63, %v176_v0 }
 0x129   :  { %v2288_v9 = vperm.slane %v245_v4, %v2258_v29  ;;  %v273_v22 = vrot.slane %v2285_v6, 4 }
 0x12b   :  { %v261_v23 = vrot.slane %v2288_v9, 4  ;;  %v274_v32 = vsel %vm127_vm1, %v273_v22, %v2299_v28 }
 0x12c   :  { %v280_v40 = vperm.slane %v274_v32, %v2268_v44 }
 0x12e   :  { %v285_v59 = vrot.slane %v280_v40, 4 }
 0x165   :  { %v370_v1 = vpop.permute.xlu2 %369 }
 0x166   :  { %v385_v5 = vrot.slane %v370_v1, 4  ;;  %v388_v18 = vsel %vm127_vm1, %v370_v1, %v387_v7 }
 0x167   :  { %v396_v25 = vperm.slane %v388_v18, %v2258_v29 }
 0x168   :  { %v386_v13 = vsel %vm127_vm1, %v385_v5, %v362_v21  ;;  %v2302_v21 = vperm.slane %v239_v20, %v2258_v29 }
 0x169   :  { %v392_v24 = vperm.slane %v386_v13, %v2258_v29  ;;  %v423_v37 = vrot.slane %v396_v25, 4 }
 0x16a   :  { %v262_v35 = vsel %vm127_vm1, %v261_v23, %v2302_v21 }
 0x16b   :  { %v411_v36 = vrot.slane %v392_v24, 4  ;;  %v268_v49 = vperm.slane %v262_v35, %v2268_v44 }
 0x16d   :  { %v368_v47 = vpop.permute.xlu2 %367  ;;  %v287_v4 = vrot.slane %v268_v49, 4 }
 0x16e   :  { %v455_v50 = vrot.slane %v368_v47, 4 }
 0x16f   :  { %v2338_v32 = vsel %vm127_vm1, %v280_v40, %v287_v4 }
 0x174   :  { %v374_v26 = vpop.permute.xlu0 %373  ;;  %v366_v27 = vpop.permute.xlu1 %365 }
 0x175   :  { %v397_v30 = vrot.slane %v374_v26, 4  ;;  %v399_v31 = vrot.slane %v366_v27, 4 }
 0x177   :  { %v398_v33 = vsel %vm127_vm1, %v397_v30, %v366_v27  ;;  %v400_v34 = vsel %vm127_vm1, %v374_v26, %v399_v31  ;;  %v263_v26 = vrot.slane %v2302_v21, 4  ;;  %v2335_v27 = vsel %vm127_vm1, %v285_v59, %v268_v49 }
 0x178   :  { %v404_v38 = vperm.slane %v398_v33, %v2258_v29  ;;  %v408_v39 = vperm.slane %v400_v34, %v2258_v29 }
 0x17a   :  { %v409_v41 = vrot.slane %v404_v38, 4  ;;  %v412_v42 = vsel %vm127_vm1, %v404_v38, %v411_v36  ;;  %v421_v43 = vrot.slane %v408_v39, 4  ;;  %v424_v45 = vsel %vm127_vm1, %v408_v39, %v423_v37 }
 0x17b   :  { %v420_v48 = vperm.slane %v412_v42, %v2268_v44  ;;  %v432_v53 = vperm.slane %v424_v45, %v2268_v44  ;;  %v111_v45 = vpop.permute.xlu2 %110 }
 0x17c   :  { %v410_v51 = vsel %vm127_vm1, %v409_v41, %v392_v24  ;;  %v422_v52 = vsel %vm127_vm1, %v421_v43, %v396_v25  ;;  %v372_v54 = vpop.permute.xlu0 %371  ;;  %v376_v55 = vpop.permute.xlu1 %375 }
 0x17d   :  { %v416_v56 = vperm.slane %v410_v51, %v2268_v44  ;;  %v435_v57 = vrot.slane %v420_v48, 4  ;;  %v441_v60 = vrot.slane %v372_v54, 4  ;;  %v444_v61 = vsel %vm127_vm1, %v372_v54, %v443_v46 }
 0x17e   :  { %v453_v62 = vrot.slane %v376_v55, 4  ;;  %v456_v63 = vsel %vm127_vm1, %v376_v55, %v455_v50  ;;  %v428_v0 = vperm.slane %v422_v52, %v2268_v44  ;;  %v439_v5 = vrot.slane %v432_v53, 4 }
 0x17f   :  { %v433_v1 = vrot.slane %v416_v56, 4  ;;  %v436_v2 = vsel %vm127_vm1, 0.0, %v435_v57  ;;  %v442_v11 = vsel %vm127_vm1, %v441_v60, %v364_v3  ;;  %v452_v13 = vperm.slane %v444_v61, %v2258_v29 }
 0x180   :  { %v502_v7 = vrot.slane %v436_v2, 4  ;;  %v448_v20 = vperm.slane %v442_v11, %v2258_v29  ;;  %v454_v22 = vsel %vm127_vm1, %v453_v62, %v368_v47  ;;  %v464_v23 = vperm.slane %v456_v63, %v2258_v29 }
 0x181   :  { %v434_v18 = vsel %vm127_vm1, 0.0, %v433_v1  ;;  %v479_v24 = vrot.slane %v452_v13, 4  ;;  %v460_v25 = vperm.slane %v454_v22, %v2258_v29  ;;  %v437_v30 = vrot.slane %v428_v0, 4 }
 0x182   :  { %v467_v3 = vrot.slane %v448_v20, 4  ;;  %v477_v31 = vrot.slane %v464_v23, 4  ;;  %v440_v33 = vsel %vm127_vm1, 0.0, %v439_v5  ;;  %v503_v37 = vsel %vm127_vm1, %v502_v7, %v434_v18 }
 0x183   :  { %v465_v34 = vrot.slane %v460_v25, 4  ;;  %v480_v35 = vsel %vm127_vm1, %v464_v23, %v479_v24  ;;  %v497_v52 = vsel %vm127_vm1, %v435_v57, %v416_v56  ;;  %v513_v53 = vrot.slane %v440_v33, 4 }
 0x184   :  { %v117_v36 = vpop.permute.xlu0 %116  ;;  %v468_v38 = vsel %vm127_vm1, %v460_v25, %v467_v3  ;;  %v478_v39 = vsel %vm127_vm1, %v477_v31, %v452_v13  ;;  %v488_v41 = vperm.slane %v480_v35, %v2268_v44  ;;  %v123_v43 = vpop.permute.xlu1 %122  ;;  %v197_v60 = vrot.slane %v111_v45, 4 }
 0x185   :  { %v183_v42 = vrot.slane %v117_v36, 4  ;;  %v466_v40 = vsel %vm127_vm1, %v465_v34, %v448_v20  ;;  %v476_v46 = vperm.slane %v468_v38, %v2268_v44  ;;  %v484_v47 = vperm.slane %v478_v39, %v2268_v44 }
 0x186   :  { %v186_v48 = vsel %vm127_vm1, %v117_v36, %v185_v58  ;;  %v2351_v49 = vperm.slane %v466_v40, %v2268_v44  ;;  %v495_v54 = vrot.slane %v488_v41, 4  ;;  %v195_v59 = vrot.slane %v123_v43, 4 }
 0x187   :  { %v184_v50 = vsel %vm127_vm1, %v183_v42, %v2249_v19  ;;  %v194_v51 = vperm.slane %v186_v48, %v2258_v29  ;;  %v491_v61 = vrot.slane %v476_v46, 4  ;;  %v438_v62 = vsel %vm127_vm1, 0.0, %v437_v30 }
 0x188   :  { %v190_v55 = vperm.slane %v184_v50, %v2258_v29  ;;  %v507_v58 = vperm.slane %v503_v37, %v2258_v29  ;;  %v493_v63 = vrot.slane %v484_v47, 4  ;;  %v501_v2 = vperm.slane %v497_v52, %v2258_v29 }
 0x189   :  { %v221_v1 = vrot.slane %v194_v51, 4  ;;  %v508_v19 = vsel %vm127_vm1, %v439_v5, %v428_v0  ;;  %v489_v4 = vrot.slane %v2351_v49, 4  ;;  %v196_v57 = vsel %vm127_vm1, %v195_v59, %v111_v45 }
 0x18a   :  { %v209_v56 = vrot.slane %v190_v55, 4  ;;  %v198_v7 = vsel %vm127_vm1, %v123_v43, %v197_v60  ;;  %v496_v11 = vsel %vm127_vm1, 0.0, %v495_v54  ;;  %v202_v13 = vperm.slane %v196_v57, %v2258_v29 }
 0x18b   :  { %v206_v18 = vperm.slane %v198_v7, %v2258_v29  ;;  %v514_v20 = vsel %vm127_vm1, %v513_v53, %v438_v62  ;;  %v492_v22 = vsel %vm127_vm1, 0.0, %v491_v61  ;;  %v562_v23 = vsel %vm127_vm1, %v495_v54, %v484_v47 }
 0x18c   :  { %v518_v0 = vperm.slane %v514_v20, %v2258_v29  ;;  %v519_v5 = vrot.slane %v507_v58, 4  ;;  %v207_v24 = vrot.slane %v202_v13, 4  ;;  %v210_v25 = vsel %vm127_vm1, %v202_v13, %v209_v56  ;;  %v1960_v15 = vpop.permute.xlu1 %1959 }
 0x18d   :  { %v219_v30 = vrot.slane %v206_v18, 4  ;;  %v222_v3 = vsel %vm127_vm1, %v206_v18, %v221_v1  ;;  %v494_v31 = vsel %vm127_vm1, 0.0, %v493_v63  ;;  %v218_v33 = vperm.slane %v210_v25, %v2268_v44 }
 0x18e   :  { %v230_v34 = vperm.slane %v222_v3, %v2268_v44  ;;  %v512_v35 = vperm.slane %v508_v19, %v2258_v29  ;;  %v566_v36 = vperm.slane %v562_v23, %v2258_v29  ;;  %v208_v37 = vsel %vm127_vm1, %v207_v24, %v190_v55 }
 0x18f   :  { %v220_v38 = vsel %vm127_vm1, %v219_v30, %v194_v51  ;;  %v520_v39 = vsel %vm127_vm1, %v519_v5, %v501_v2  ;;  %v214_v41 = vperm.slane %v208_v37, %v2268_v44  ;;  %v233_v43 = vrot.slane %v218_v33, 4 }
 0x190   :  { %v226_v42 = vperm.slane %v220_v38, %v2268_v44  ;;  %v237_v45 = vrot.slane %v230_v34, 4  ;;  %v556_v40 = vrot.slane %v492_v22, 4  ;;  %v567_v46 = vrot.slane %v496_v11, 4 }
 0x191   :  { %v526_v47 = vperm.slane %v520_v39, %v2268_v44  ;;  %v531_v48 = vrot.slane %v518_v0, 4  ;;  %v234_v50 = vsel %vm127_vm1, 0.0, %v233_v43  ;;  %v521_v53 = vrot.slane %v501_v2, 4 }
 0x192   :  { %v238_v52 = vsel %vm127_vm1, 0.0, %v237_v45  ;;  %v533_v54 = vrot.slane %v512_v35, 4  ;;  %v231_v51 = vrot.slane %v214_v41, 4  ;;  %v235_v55 = vrot.slane %v226_v42, 4 }
 0x193   :  { %v532_v59 = vsel %vm127_vm1, %v531_v48, %v512_v35  ;;  %v490_v60 = vsel %vm127_vm1, 0.0, %v489_v4  ;;  %v298_v62 = vrot.slane %v234_v50, 4  ;;  %v304_v63 = vsel %vm127_vm1, %v237_v45, %v226_v42 }
 0x194   :  { %v538_v1 = vperm.slane %v532_v59, %v2268_v44  ;;  %v545_v19 = vrot.slane %v526_v47, 4  ;;  %v309_v56 = vrot.slane %v238_v52, 4  ;;  %v551_v57 = vsel %vm127_vm1, %v491_v61, %v2351_v49 }
 0x195   :  { %v557_v7 = vsel %vm127_vm1, %v556_v40, %v490_v60  ;;  %v568_v2 = vsel %vm127_vm1, %v567_v46, %v494_v31  ;;  %v555_v18 = vperm.slane %v551_v57, %v2258_v29  ;;  %v587_v22 = vrot.slane %v566_v36, 4 }
 0x196   :  { %v543_v11 = vrot.slane %v538_v1, 4  ;;  %v546_v13 = vsel %vm127_vm1, %v538_v1, %v545_v19  ;;  %v561_v4 = vperm.slane %v557_v7, %v2258_v29  ;;  %v572_v20 = vperm.slane %v568_v2, %v2258_v29 }
 0x197   :  { %1912 = vmatpush.xpose.msk.msra.mxu3 %vm849_vm2, %v546_v13  ;;  %v522_v23 = vsel %vm127_vm1, %v507_v58, %v521_v53  ;;  %v534_v49 = vsel %vm127_vm1, %v518_v0, %v533_v54  ;;  %v575_v5 = vrot.slane %v555_v18, 4  ;;  %v236_v30 = vsel %vm127_vm1, 0.0, %v235_v55 }
 0x198   :  { %v544_v61 = vsel %vm127_vm1, %v543_v11, %v526_v47  ;;  %v573_v24 = vrot.slane %v561_v4, 4  ;;  %v530_v25 = vperm.slane %v522_v23, %v2268_v44  ;;  %v588_v3 = vsel %vm127_vm1, %v572_v20, %v587_v22 }
 0x199   :  { %1908 = vmatpush.xpose.msk.msra.mxu2 %vm849_vm2, %v544_v61  ;;  %v585_v31 = vrot.slane %v572_v20, 4  ;;  %v542_v33 = vperm.slane %v534_v49, %v2268_v44  ;;  %v308_v34 = vperm.slane %v304_v63, %v2258_v29  ;;  %v576_v58 = vsel %vm127_vm1, %v561_v4, %v575_v5 }
 0x19a   :  { %1913 = vmatmul.msk.f32.vlgmr.msra.gmra.mxu3 %vm849_vm2, %v2338_v32  ;;  %v596_v0 = vperm.slane %v588_v3, %v2268_v44  ;;  %v574_v35 = vsel %vm127_vm1, %v573_v24, %v555_v18  ;;  %v310_v37 = vsel %vm127_vm1, %v309_v56, %v236_v30  ;;  %v584_v38 = vperm.slane %v576_v58, %v2268_v44 }
 0x19b   :  { %v580_v39 = vperm.slane %v574_v35, %v2268_v44  ;;  %v586_v42 = vsel %vm127_vm1, %v585_v31, %v566_v36  ;;  %v549_v40 = vrot.slane %v530_v25, 4  ;;  %v293_v46 = vsel %vm127_vm1, %v233_v43, %v214_v41 }
 0x19c   :  { %1909 = vmatmul.msk.f32.vlgmr.msra.gmra.mxu2 %vm849_vm2, %v2335_v27  ;;  %v601_v45 = vrot.slane %v596_v0, 4  ;;  %v592_v32 = vperm.slane %v586_v42, %v2268_v44  ;;  %v547_v47 = vrot.slane %v542_v33, 4  ;;  %v232_v50 = vsel %vm127_vm1, 0.0, %v231_v51 }
 0x19d   :  { %v599_v48 = vrot.slane %v580_v39, 4  ;;  %v297_v52 = vperm.slane %v293_v46, %v2258_v29  ;;  %v299_v36 = vsel %vm127_vm1, %v298_v62, %v232_v50  ;;  %v314_v55 = vperm.slane %v310_v37, %v2258_v29 }
 0x19e   :  { %v602_v53 = vsel %vm127_vm1, %v601_v45, %v584_v38  ;;  %v597_v54 = vrot.slane %v592_v32, 4  ;;  %v303_v59 = vperm.slane %v299_v36, %v2258_v29  ;;  %v329_v43 = vrot.slane %v308_v34, 4 }
 0x19f   :  { %1918 = vmatpush.xpose.msk.msrb.mxu3 %vm849_vm2, %v602_v53  ;;  %v600_v27 = vsel %vm127_vm1, %v592_v32, %v599_v48  ;;  %v317_v41 = vrot.slane %v297_v52, 4  ;;  %v275_v60 = vrot.slane %v2299_v28, 4  ;;  %v550_v63 = vsel %vm127_vm1, %v542_v33, %v549_v40 }
 0x1a0   :  { %v598_v51 = vsel %vm127_vm1, %v597_v54, %v580_v39  ;;  %1914 = vmatpush.xpose.msk.msra.mxu1 %vm849_vm2, %v600_v27  ;;  %v327_v1 = vrot.slane %v314_v55, 4  ;;  %v548_v62 = vsel %vm127_vm1, %v547_v47, %v530_v25  ;;  %v330_v56 = vsel %vm127_vm1, %v314_v55, %v329_v43 }
 0x1a1   :  { %1910 = vmatpush.xpose.msk.msrb.mxu2 %vm849_vm2, %v598_v51  ;;  %v318_v19 = vsel %vm127_vm1, %v303_v59, %v317_v41  ;;  %v315_v57 = vrot.slane %v303_v59, 4  ;;  %v338_v7 = vperm.slane %v330_v56, %v2268_v44  ;;  %v603_v18 = vrot.slane %v584_v38, 4 }
 0x1a2   :  { %v326_v28 = vperm.slane %v318_v19, %v2268_v44  ;;  %v328_v2 = vsel %vm127_vm1, %v327_v1, %v308_v34  ;;  %v276_v22 = vsel %vm127_vm1, %v2285_v6, %v275_v60  ;;  %v264_v49 = vsel %vm127_vm1, %v2288_v9, %v263_v26 }
 0x1a3   :  { %v316_v11 = vsel %vm127_vm1, %v315_v57, %v297_v52  ;;  %v334_v13 = vperm.slane %v328_v2, %v2268_v44  ;;  %v343_v4 = vrot.slane %v338_v7, 4  ;;  %v284_v25 = vperm.slane %v276_v22, %v2268_v44 }
 0x1a4   :  { %1920 = vmatpush.xpose.msk.msrb.mxu1 %vm849_vm2, %v550_v63  ;;  %v322_v20 = vperm.slane %v316_v11, %v2268_v44  ;;  %v604_v30 = vsel %vm127_vm1, %v596_v0, %v603_v18  ;;  %v272_v21 = vperm.slane %v264_v49, %v2268_v44  ;;  %v345_v33 = vrot.slane %v326_v28, 4 }
 0x1a5   :  { %1916 = vmatpush.xpose.msk.msra.mxu2 %vm849_vm2, %v548_v62  ;;  %v339_v23 = vrot.slane %v334_v13, 4  ;;  %v344_v61 = vsel %vm127_vm1, %v343_v4, %v326_v28  ;;  %v289_v9 = vrot.slane %v284_v25, 4  ;;  %v1953_v54 = vpack.i.bf16 %v2237_v14, %v2216_v8 }
 0x1a6   :  { %v341_v5 = vrot.slane %v322_v20, 4  ;;  %1919 = vmatmul.msk.f32.vlgmr.msrb.gmra.mxu3 %vm849_vm2, %v344_v61  ;;  %v291_v26 = vrot.slane %v272_v21, 4  ;;  %v346_v34 = vsel %vm127_vm1, %v338_v7, %v345_v33  ;;  %v1963_v36 = vpack.i.bf16 %v2222_v10, %v2235_v12 }
 0x1a7   :  { %v340_v24 = vsel %vm127_vm1, %v339_v23, %v322_v20  ;;  %v290_v3 = vsel %vm127_vm1, %v289_v9, %v272_v21  ;;  %v1961_v21 = vunpack.i.l.bf16 %v1960_v15 }
 0x1a8   :  { %1911 = vmatmul.msk.f32.vlgmr.msrb.gmra.mxu2 %vm849_vm2, %v340_v24  ;;  %v342_v6 = vsel %vm127_vm1, %v334_v13, %v341_v5  ;;  %v292_v31 = vsel %vm127_vm1, %v284_v25, %v291_v26 }
 0x1a9   :  { %1922 = vmatpush.xpose.msk.msrb.mxu2 %vm849_vm2, %v604_v30  ;;  %1915 = vmatmul.msk.f32.vlgmr.msra.gmra.mxu1 %vm849_vm2, %v342_v6  ;;  %v1962_v30 = vunpack.i.h.bf16 %v1960_v15 }
 0x1b0   :  { %1917 = vmatmul.msk.f32.vlgmr.msra.gmra.mxu2 %vm849_vm2, %v290_v3 }
 0x1b1   :  { %1921 = vmatmul.msk.f32.vlgmr.msrb.gmra.mxu1 %vm849_vm2, %v292_v31  ;;  %v641_v31 = vrot.slane %v1962_v30, 4 }
 0x1b8   :  { %1923 = vmatmul.msk.f32.vlgmr.msrb.gmra.mxu2 %vm849_vm2, %v346_v34 }
 0x21d   :  { %v925_v58 = vpop.f32.mrf.mxu3 }
 0x21e   :  { %1060 = vst.msk [vmem:[#allocation6 + $0x10] sm:$0xff] %vm849_vm2, %v925_v58  ;;  %v1072_v0 = vsel %vm849_vm2, %v925_v58, -inf }
 0x21f   :  { %v873_v35 = vpop.f32.mrf.mxu2  ;;  %1073 = vmax.xlane.f32.xlu0 %v1072_v0 }
 0x220   :  { %1058 = vst.msk [vmem:[#allocation6] sm:$0xff] %vm849_vm2, %v873_v35  ;;  %v1066_v37 = vsel %vm849_vm2, %v873_v35, -inf }
 0x221   :  { %1067 = vmax.xlane.f32.xlu2 %v1066_v37 }
 0x226   :  { %v951_v38 = vpop.f32.mrf.mxu1 }
 0x227   :  { %1061 = vst.msk [vmem:[#allocation6 + $0x18] sm:$0xff] %vm849_vm2, %v951_v38  ;;  %v1075_v39 = vsel %vm849_vm2, %v951_v38, -inf }
 0x229   :  { %1076 = vmax.xlane.f32.xlu2 %v1075_v39  ;;  %v2474_v42 = vpop.f32.mrf.mxu3 }
 0x22a   :  { %1063 = vst.msk [vmem:[#allocation6 + $0x28] sm:$0xff] %vm849_vm2, %v2474_v42  ;;  %v1081_v50 = vsel %vm849_vm2, %v2474_v42, -inf }
 0x22b   :  { %v899_v45 = vpop.f32.mrf.mxu2 }
 0x22c   :  { %1059 = vst.msk [vmem:[#allocation6 + $0x8] sm:$0xff] %vm849_vm2, %v899_v45  ;;  %v1069_v46 = vsel %vm849_vm2, %v899_v45, -inf }
 0x22e   :  { %v1029_v32 = vpop.f32.mrf.mxu1 }
 0x22f   :  { %1064 = vst.msk [vmem:[#allocation6 + $0x30] sm:$0xff] %vm849_vm2, %v1029_v32  ;;  %v1084_v40 = vsel %vm849_vm2, %v1029_v32, -inf }
 0x230   :  { %1085 = vmax.xlane.f32.xlu0 %v1084_v40 }
 0x231   :  { %1070 = vmax.xlane.f32.xlu2 %v1069_v46 }
 0x233   :  { %v977_v47 = vpop.f32.mrf.mxu2 }
 0x234   :  { %1062 = vst.msk [vmem:[#allocation6 + $0x20] sm:$0xff] %vm849_vm2, %v977_v47  ;;  %v1078_v48 = vsel %vm849_vm2, %v977_v47, -inf }
 0x235   :  { %1079 = vmax.xlane.f32.xlu1 %v1078_v48 }
 0x239   :  { %1082 = vmax.xlane.f32.xlu2 %v1081_v50 }
 0x23b   :  { %v1055_v52 = vpop.f32.mrf.mxu2 }
 0x23c   :  { %1065 = vst.msk [vmem:[#allocation6 + $0x38] sm:$0xff] %vm849_vm2, %v1055_v52  ;;  %v1087_v53 = vsel %vm849_vm2, %v1055_v52, -inf }
 0x23d   :  { %1088 = vmax.xlane.f32.xlu1 %v1087_v53 }
 0x244   :  { %1954 = vrot.lane.b32.xlu0 %v1953_v54, %s2110_s15 }
 0x251   :  { %1964 = vrot.lane.b32.xlu2 %v1963_v36, %s2110_s15 }
 0x256   :  { %1969 = vrot.lane.b32.xlu1 %v1968_v17, %s2110_s15 }
 0x292   :  { %v1074_v55 = vpop.xlane.xlu0 %1073 }
 0x293   :  { %v1092_v27 = vsub.f32 %v925_v58, %v1074_v55  ;;  %v629_v58 = vrot.slane %v1961_v21, 4 }
 0x294   :  { %v1068_v59 = vpop.xlane.xlu2 %1067 }
 0x295   :  { %v1102_v41 = vmul.f32 1.442695, %v1092_v27  ;;  %v1090_v43 = vsub.f32 %v873_v35, %v1068_v59 }
 0x297   :  { %1981 = vpow2.f32 %v1102_v41  ;;  %v1098_v60 = vmul.f32 1.442695, %v1090_v43 }
 0x299   :  { %1983 = vpow2.f32 %v1098_v60 }
 0x29c   :  { %v1077_v8 = vpop.xlane.xlu2 %1076 }
 0x29d   :  { %v2498_v14 = vpop.eup %1981  ;;  %v1093_v51 = vsub.f32 %v951_v38, %v1077_v8 }
 0x29e   :  { %v1120_v10 = vsel %vm849_vm2, %v2498_v14, 0.0 }
 0x29f   :  { %v2502_v12 = vpop.eup %1983  ;;  %v1104_v63 = vmul.f32 1.442695, %v1093_v51  ;;  %1121 = vadd.xlane.f32.xlu2 %v1120_v10 }
 0x2a0   :  { %v1114_v16 = vsel %vm849_vm2, %v2502_v12, 0.0 }
 0x2a1   :  { %1985 = vpow2.f32 %v1104_v63  ;;  %1115 = vadd.xlane.f32.xlu0 %v1114_v16 }
 0x2a3   :  { %v1086_v17 = vpop.xlane.xlu0 %1085 }
 0x2a4   :  { %v1096_v1 = vsub.f32 %v1029_v32, %v1086_v17  ;;  %v1071_v62 = vpop.xlane.xlu2 %1070 }
 0x2a5   :  { %v1091_v19 = vsub.f32 %v899_v45, %v1071_v62 }
 0x2a6   :  { %v1110_v56 = vmul.f32 1.442695, %v1096_v1 }
 0x2a7   :  { %v2506_v57 = vpop.eup %1985  ;;  %v1100_v28 = vmul.f32 1.442695, %v1091_v19 }
 0x2a8   :  { %1987 = vpow2.f32 %v1110_v56  ;;  %v1080_v7 = vpop.xlane.xlu1 %1079  ;;  %v1123_v2 = vsel %vm849_vm2, %v2506_v57, 0.0 }
 0x2a9   :  { %1989 = vpow2.f32 %v1100_v28  ;;  %v1094_v11 = vsub.f32 %v977_v47, %v1080_v7  ;;  %1124 = vadd.xlane.f32.xlu0 %v1123_v2 }
 0x2ab   :  { %v1106_v13 = vmul.f32 1.442695, %v1094_v11 }
 0x2ac   :  { %v1083_v18 = vpop.xlane.xlu2 %1082 }
 0x2ad   :  { %1991 = vpow2.f32 %v1106_v13  ;;  %v1095_v4 = vsub.f32 %v2474_v42, %v1083_v18 }
 0x2ae   :  { %v2511_v20 = vpop.eup %1987 }
 0x2af   :  { %v2513_v22 = vpop.eup %1989  ;;  %v1108_v23 = vmul.f32 1.442695, %v1095_v4  ;;  %v1132_v49 = vsel %vm849_vm2, %v2511_v20, 0.0 }
 0x2b0   :  { %v1089_v61 = vpop.xlane.xlu1 %1088  ;;  %1133 = vadd.xlane.f32.xlu2 %v1132_v49  ;;  %v1117_v5 = vsel %vm849_vm2, %v2513_v22, 0.0 }
 0x2b1   :  { %1993 = vpow2.f32 %v1108_v23  ;;  %v1097_v24 = vsub.f32 %v1055_v52, %v1089_v61  ;;  %1118 = vadd.xlane.f32.xlu0 %v1117_v5 }
 0x2b3   :  { %v2519_v25 = vpop.eup %1991  ;;  %v1112_v6 = vmul.f32 1.442695, %v1097_v24 }
 0x2b4   :  { %v1126_v9 = vsel %vm849_vm2, %v2519_v25, 0.0  ;;  %v1965_v35 = vpop.permute.xlu2 %1964 }
 0x2b5   :  { %1995 = vpow2.f32 %v1112_v6  ;;  %1127 = vadd.xlane.f32.xlu1 %v1126_v9  ;;  %v1966_v47 = vunpack.i.l.bf16 %v1965_v35  ;;  %v1967_v36 = vunpack.i.h.bf16 %v1965_v35 }
 0x2b6   :  { %v1955_v26 = vpop.permute.xlu0 %1954 }
 0x2b7   :  { %v2523_v3 = vpop.eup %1993  ;;  %v1957_v33 = vunpack.i.h.bf16 %v1955_v26  ;;  %v1956_v34 = vunpack.i.l.bf16 %v1955_v26  ;;  %v685_v60 = vrot.slane %v1966_v47, 4  ;;  %v687_v15 = vrot.slane %v1967_v36, 4 }
 0x2b8   :  { %v1129_v0 = vsel %vm849_vm2, %v2523_v3, 0.0 }
 0x2b9   :  { %v642_v37 = vsel %vm127_vm1, %v641_v31, %v1957_v33  ;;  %v643_v38 = vrot.slane %v1957_v33, 4  ;;  %1130 = vadd.xlane.f32.xlu0 %v1129_v0  ;;  %v630_v42 = vsel %vm127_vm1, %v629_v58, %v1956_v34  ;;  %v631_v40 = vrot.slane %v1956_v34, 4 }
 0x2ba   :  { %v648_v39 = vperm.slane %v642_v37, %v2258_v29  ;;  %v636_v46 = vperm.slane %v630_v42, %v2258_v29  ;;  %v686_v19 = vsel %vm127_vm1, %v685_v60, %v1967_v36  ;;  %v688_v18 = vsel %vm127_vm1, %v1966_v47, %v687_v15 }
 0x2bb   :  { %v2530_v45 = vpop.eup %1995  ;;  %v644_v32 = vsel %vm127_vm1, %v1962_v30, %v643_v38  ;;  %v632_v52 = vsel %vm127_vm1, %v1961_v21, %v631_v40  ;;  %v692_v24 = vperm.slane %v686_v19, %v2258_v29  ;;  %v696_v26 = vperm.slane %v688_v18, %v2258_v29 }
 0x2bc   :  { %v652_v48 = vperm.slane %v644_v32, %v2258_v29  ;;  %v653_v50 = vrot.slane %v648_v39, 4  ;;  %v655_v53 = vrot.slane %v636_v46, 4  ;;  %v1135_v54 = vsel %vm849_vm2, %v2530_v45, 0.0 }
 0x2bd   :  { %v640_v27 = vperm.slane %v632_v52, %v2258_v29  ;;  %1136 = vadd.xlane.f32.xlu1 %v1135_v54  ;;  %v711_v40 = vrot.slane %v692_v24, 4 }
 0x2be   :  { %v665_v55 = vrot.slane %v652_v48, 4  ;;  %v654_v59 = vsel %vm127_vm1, %v653_v50, %v636_v46  ;;  %v656_v41 = vsel %vm127_vm1, %v648_v39, %v655_v53  ;;  %v723_v53 = vrot.slane %v696_v26, 4 }
 0x2bf   :  { %v660_v43 = vperm.slane %v654_v59, %v2268_v44  ;;  %v664_v8 = vperm.slane %v656_v41, %v2268_v44  ;;  %v667_v10 = vrot.slane %v640_v27, 4 }
 0x2c0   :  { %v666_v51 = vsel %vm127_vm1, %v665_v55, %v640_v27 }
 0x2c1   :  { %v672_v63 = vperm.slane %v666_v51, %v2268_v44  ;;  %v668_v16 = vsel %vm127_vm1, %v652_v48, %v667_v10  ;;  %v677_v17 = vrot.slane %v660_v43, 4  ;;  %v679_v1 = vrot.slane %v664_v8, 4 }
 0x2c2   :  { %v676_v62 = vperm.slane %v668_v16, %v2268_v44 }
 0x2c3   :  { %v680_v56 = vsel %vm127_vm1, 0.0, %v679_v1  ;;  %v741_v28 = vsel %vm127_vm1, %v679_v1, %v660_v43  ;;  %v681_v7 = vrot.slane %v672_v63, 4  ;;  %v678_v4 = vsel %vm127_vm1, 0.0, %v677_v17 }
 0x2c4   :  { %v683_v2 = vrot.slane %v676_v62, 4  ;;  %v746_v11 = vrot.slane %v680_v56, 4  ;;  %v745_v13 = vperm.slane %v741_v28, %v2258_v29 }
 0x2c5   :  { %v682_v34 = vsel %vm127_vm1, 0.0, %v681_v7 }
 0x2c6   :  { %v684_v23 = vsel %vm127_vm1, 0.0, %v683_v2  ;;  %v747_v49 = vsel %vm127_vm1, %v746_v11, %v678_v4  ;;  %v752_v61 = vsel %vm127_vm1, %v683_v2, %v672_v63  ;;  %v765_v5 = vrot.slane %v745_v13, 4 }
 0x2c7   :  { %v757_v30 = vrot.slane %v684_v23, 4  ;;  %v751_v21 = vperm.slane %v747_v49, %v2258_v29  ;;  %v756_v9 = vperm.slane %v752_v61, %v2258_v29 }
 0x2c8   :  { %v1970_v6 = vpop.permute.xlu1 %1969 }
 0x2c9   :  { %v1972_v31 = vunpack.i.h.bf16 %v1970_v6  ;;  %v1971_v33 = vunpack.i.l.bf16 %v1970_v6  ;;  %v758_v58 = vsel %vm127_vm1, %v757_v30, %v682_v34  ;;  %v763_v0 = vrot.slane %v751_v21, 4 }
 0x2ca   :  { %v766_v35 = vsel %vm127_vm1, %v751_v21, %v765_v5  ;;  %v777_v37 = vrot.slane %v756_v9, 4  ;;  %v762_v42 = vperm.slane %v758_v58, %v2258_v29 }
 0x2cb   :  { %v699_v38 = vrot.slane %v1972_v31, 4  ;;  %v697_v39 = vrot.slane %v1971_v33, 4  ;;  %v774_v32 = vperm.slane %v766_v35, %v2268_v44  ;;  %v764_v46 = vsel %vm127_vm1, %v763_v0, %v745_v13 }
 0x2cc   :  { %v770_v50 = vperm.slane %v764_v46, %v2268_v44  ;;  %v775_v52 = vrot.slane %v762_v42, 4  ;;  %v778_v55 = vsel %vm127_vm1, %v762_v42, %v777_v37 }
 0x2cd   :  { %v698_v47 = vsel %vm127_vm1, %v697_v39, %v1972_v31  ;;  %v700_v48 = vsel %vm127_vm1, %v1971_v33, %v699_v38  ;;  %v786_v41 = vperm.slane %v778_v55, %v2268_v44  ;;  %v793_v43 = vrot.slane %v774_v32, 4 }
 0x2ce   :  { %v704_v54 = vperm.slane %v698_v47, %v2258_v29  ;;  %v708_v36 = vperm.slane %v700_v48, %v2258_v29  ;;  %v776_v27 = vsel %vm127_vm1, %v775_v52, %v756_v9  ;;  %v789_v59 = vrot.slane %v770_v50, 4 }
 0x2cf   :  { %v782_v16 = vperm.slane %v776_v27, %v2268_v44  ;;  %v791_v62 = vrot.slane %v786_v41, 4  ;;  %v794_v11 = vsel %vm127_vm1, %v786_v41, %v793_v43 }
 0x2d0   :  { %v709_v60 = vrot.slane %v704_v54, 4  ;;  %v712_v8 = vsel %vm127_vm1, %v704_v54, %v711_v40  ;;  %v721_v51 = vrot.slane %v708_v36, 4  ;;  %v724_v10 = vsel %vm127_vm1, %v708_v36, %v723_v53 }
 0x2d1   :  { %v720_v63 = vperm.slane %v712_v8, %v2268_v44  ;;  %v732_v15 = vperm.slane %v724_v10, %v2268_v44  ;;  %v790_v2 = vsel %vm127_vm1, %v782_v16, %v789_v59  ;;  %v787_v13 = vrot.slane %v782_v16, 4 }
 0x2d2   :  { %v710_v17 = vsel %vm127_vm1, %v709_v60, %v692_v24  ;;  %v722_v1 = vsel %vm127_vm1, %v721_v51, %v696_v26  ;;  %v792_v18 = vsel %vm127_vm1, %v791_v62, %v774_v32  ;;  %1242 = vmatpush.msra.mxu1 %v790_v2 }
 0x2d3   :  { %v716_v19 = vperm.slane %v710_v17, %v2268_v44  ;;  %v728_v56 = vperm.slane %v722_v1, %v2268_v44  ;;  %v735_v28 = vrot.slane %v720_v63, 4  ;;  %v739_v7 = vrot.slane %v732_v15, 4 }
 0x2d4   :  { %1334 = vmatpush.msrb.mxu1 %v794_v11  ;;  %v788_v30 = vsel %vm127_vm1, %v787_v13, %v770_v50 }
 0x2d5   :  { %v733_v4 = vrot.slane %v716_v19, 4  ;;  %v736_v23 = vsel %vm127_vm1, 0.0, %v735_v28  ;;  %v737_v49 = vrot.slane %v728_v56, 4  ;;  %v740_v61 = vsel %vm127_vm1, 0.0, %v739_v7  ;;  %1196 = vmatpush.msra.mxu3 %v788_v30 }
 0x2d6   :  { %v800_v5 = vrot.slane %v736_v23, 4  ;;  %v811_v24 = vrot.slane %v740_v61, 4  ;;  %v795_v6 = vsel %vm127_vm1, %v735_v28, %v716_v19  ;;  %v806_v31 = vsel %vm127_vm1, %v739_v7, %v728_v56 }
 0x2d7   :  { %v734_v21 = vsel %vm127_vm1, 0.0, %v733_v4  ;;  %v738_v9 = vsel %vm127_vm1, 0.0, %v737_v49  ;;  %v799_v26 = vperm.slane %v795_v6, %v2258_v29  ;;  %1288 = vmatpush.msrb.mxu3 %v792_v18  ;;  %v810_v34 = vperm.slane %v806_v31, %v2258_v29 }
 0x2d8   :  { %v801_v33 = vsel %vm127_vm1, %v800_v5, %v734_v21  ;;  %v812_v58 = vsel %vm127_vm1, %v811_v24, %v738_v9 }
 0x2d9   :  { %v805_v0 = vperm.slane %v801_v33, %v2258_v29  ;;  %v816_v35 = vperm.slane %v812_v58, %v2258_v29  ;;  %v819_v37 = vrot.slane %v799_v26, 4  ;;  %v831_v38 = vrot.slane %v810_v34, 4 }
 0x2db   :  { %v817_v39 = vrot.slane %v805_v0, 4  ;;  %v829_v42 = vrot.slane %v816_v35, 4  ;;  %v820_v32 = vsel %vm127_vm1, %v805_v0, %v819_v37  ;;  %v832_v46 = vsel %vm127_vm1, %v816_v35, %v831_v38 }
 0x2dc   :  { %v828_v40 = vperm.slane %v820_v32, %v2268_v44  ;;  %v840_v50 = vperm.slane %v832_v46, %v2268_v44 }
 0x2dd   :  { %v818_v47 = vsel %vm127_vm1, %v817_v39, %v799_v26  ;;  %v830_v48 = vsel %vm127_vm1, %v829_v42, %v810_v34 }
 0x2de   :  { %v824_v52 = vperm.slane %v818_v47, %v2268_v44  ;;  %v836_v53 = vperm.slane %v830_v48, %v2268_v44  ;;  %v845_v54 = vrot.slane %v840_v50, 4  ;;  %v847_v36 = vrot.slane %v828_v40, 4 }
 0x2e0   :  { %v841_v55 = vrot.slane %v836_v53, 4  ;;  %v843_v27 = vrot.slane %v824_v52, 4  ;;  %v846_v43 = vsel %vm127_vm1, %v845_v54, %v828_v40  ;;  %v848_v60 = vsel %vm127_vm1, %v840_v50, %v847_v36 }
 0x2e2   :  { %v842_v59 = vsel %vm127_vm1, %v841_v55, %v824_v52  ;;  %v844_v41 = vsel %vm127_vm1, %v836_v53, %v843_v27 }
 0x2e3   :  { %1219 = vmatpush.msrb.mxu0 %v842_v59  ;;  %1265 = vmatpush.msra.mxu2 %v844_v41 }
 0x2e5   :  { %1311 = vmatpush.msra.mxu0 %v846_v43  ;;  %1357 = vmatpush.msrb.mxu2 %v848_v60 }
 0x312   :  { %v1122_v8 = vpop.xlane.xlu2 %1121 }
 0x313   :  { %1997 = vrcp.f32 %v1122_v8 }
 0x314   :  { %v1116_v51 = vpop.xlane.xlu0 %1115 }
 0x315   :  { %1999 = vrcp.f32 %v1116_v51 }
 0x319   :  { %v1998_v10 = vpop.eup %1997 }
 0x31a   :  { %v1148_v63 = vmul.f32 %v1998_v10, %v1122_v8 }
 0x31b   :  { %v2000_v15 = vpop.eup %1999 }
 0x31c   :  { %v1146_v16 = vmul.f32 %v2000_v15, %v1116_v51  ;;  %v1156_v17 = vsub.f32 2.0, %v1148_v63  ;;  %v1125_v1 = vpop.xlane.xlu0 %1124 }
 0x31d   :  { %2001 = vrcp.f32 %v1125_v1 }
 0x31e   :  { %v1154_v62 = vsub.f32 2.0, %v1146_v16  ;;  %v1164_v19 = vmul.f32 %v1998_v10, %v1156_v17 }
 0x320   :  { %v1162_v56 = vmul.f32 %v2000_v15, %v1154_v62  ;;  %v1172_v28 = vmul.f32 %v2498_v14, %v1164_v19 }
 0x322   :  { %v1170_v7 = vmul.f32 %v2502_v12, %v1162_v56  ;;  %1926 = vmatmul.msk.f32.vlgmr.msra.gmra.mxu1 %vm849_vm2, %v1172_v28 }
 0x323   :  { %v2002_v2 = vpop.eup %2001  ;;  %v1134_v11 = vpop.xlane.xlu2 %1133 }
 0x324   :  { %v1149_v13 = vmul.f32 %v2002_v2, %v1125_v1  ;;  %1924 = vmatmul.msk.f32.vlgmr.msra.gmra.mxu3 %vm849_vm2, %v1170_v7  ;;  %v1119_v18 = vpop.xlane.xlu0 %1118  ;;  %2003 = vrcp.f32 %v1134_v11 }
 0x325   :  { %2005 = vrcp.f32 %v1119_v18 }
 0x326   :  { %v1157_v4 = vsub.f32 2.0, %v1149_v13 }
 0x328   :  { %v1165_v23 = vmul.f32 %v2002_v2, %v1157_v4  ;;  %v1128_v49 = vpop.xlane.xlu1 %1127 }
 0x329   :  { %2007 = vrcp.f32 %v1128_v49 }
 0x32a   :  { %v2004_v61 = vpop.eup %2003  ;;  %v1173_v5 = vmul.f32 %v2506_v57, %v1165_v23 }
 0x32b   :  { %v2006_v14 = vpop.eup %2005  ;;  %v1152_v24 = vmul.f32 %v2004_v61, %v1134_v11 }
 0x32c   :  { %v1147_v12 = vmul.f32 %v2006_v14, %v1119_v18  ;;  %v1131_v30 = vpop.xlane.xlu0 %1130  ;;  %1927 = vmatmul.msk.f32.vlgmr.msra.gmra.mxu2 %vm849_vm2, %v1173_v5 }
 0x32d   :  { %v1160_v6 = vsub.f32 2.0, %v1152_v24  ;;  %2009 = vrcp.f32 %v1131_v30 }
 0x32e   :  { %v1155_v21 = vsub.f32 2.0, %v1147_v12 }
 0x32f   :  { %v2008_v9 = vpop.eup %2007  ;;  %v1168_v26 = vmul.f32 %v2004_v61, %v1160_v6 }
 0x330   :  { %v1163_v31 = vmul.f32 %v2006_v14, %v1155_v21  ;;  %v1150_v33 = vmul.f32 %v2008_v9, %v1128_v49  ;;  %v1137_v58 = vpop.xlane.xlu1 %1136 }
 0x331   :  { %v1176_v34 = vmul.f32 %v2511_v20, %v1168_v26  ;;  %2011 = vrcp.f32 %v1137_v58 }
 0x332   :  { %v1171_v0 = vmul.f32 %v2513_v22, %v1163_v31  ;;  %v1158_v35 = vsub.f32 2.0, %v1150_v33 }
 0x333   :  { %v2010_v57 = vpop.eup %2009  ;;  %1930 = vmatmul.msk.f32.vlgmr.msrb.gmra.mxu1 %vm849_vm2, %v1176_v34 }
 0x334   :  { %v1166_v37 = vmul.f32 %v2008_v9, %v1158_v35  ;;  %v1151_v38 = vmul.f32 %v2010_v57, %v1131_v30  ;;  %1925 = vmatmul.msk.f32.vlgmr.msrb.gmra.mxu0 %vm849_vm2, %v1171_v0 }
 0x336   :  { %v1174_v39 = vmul.f32 %v2519_v25, %v1166_v37  ;;  %v1159_v42 = vsub.f32 2.0, %v1151_v38 }
 0x337   :  { %v2012_v32 = vpop.eup %2011 }
 0x338   :  { %v1167_v40 = vmul.f32 %v2010_v57, %v1159_v42  ;;  %1928 = vmatmul.msk.f32.vlgmr.msrb.gmra.mxu3 %vm849_vm2, %v1174_v39  ;;  %v1153_v20 = vmul.f32 %v2012_v32, %v1137_v58 }
 0x33a   :  { %v1175_v46 = vmul.f32 %v2523_v3, %v1167_v40  ;;  %v1161_v22 = vsub.f32 2.0, %v1153_v20 }
 0x33c   :  { %1929 = vmatmul.msk.f32.vlgmr.msra.gmra.mxu0 %vm849_vm2, %v1175_v46  ;;  %v1169_v47 = vmul.f32 %v2012_v32, %v1161_v22 }
 0x33e   :  { %v1177_v48 = vmul.f32 %v2530_v45, %v1169_v47 }
 0x340   :  { %1931 = vmatmul.msk.f32.vlgmr.msrb.gmra.mxu2 %vm849_vm2, %v1177_v48 }
 0x39f   :  { %v1244_v50 = vpop.f32.mrf.mxu1 }
 0x3a0   :  { %v1376_v54 = vrot.slane %v1244_v50, 4 }
 0x3a7   :  { %v1198_v25 = vpop.f32.mrf.mxu3 }
 0x3a8   :  { %v1364_v41 = vrot.slane %v1198_v25, 4 }
 0x3af   :  { %v1267_v51 = vpop.f32.mrf.mxu2 }
 0x3b0   :  { %v1336_v53 = vpop.f32.mrf.mxu1  ;;  %v1432_v14 = vrot.slane %v1267_v51, 4 }
 0x3b1   :  { %v1221_v52 = vpop.f32.mrf.mxu0  ;;  %v1374_v36 = vrot.slane %v1336_v53, 4  ;;  %v1377_v55 = vsel %vm127_vm1, %v1336_v53, %v1376_v54 }
 0x3b2   :  { %v1385_v3 = vperm.slane %v1377_v55, %v2258_v29  ;;  %v1420_v60 = vrot.slane %v1221_v52, 4 }
 0x3b3   :  { %v1375_v27 = vsel %vm127_vm1, %v1374_v36, %v1244_v50 }
 0x3b4   :  { %v1381_v45 = vperm.slane %v1375_v27, %v2258_v29  ;;  %v1398_v15 = vrot.slane %v1385_v3, 4 }
 0x3b6   :  { %v1386_v19 = vrot.slane %v1381_v45, 4 }
 0x3b9   :  { %v1313_v59 = vpop.f32.mrf.mxu0 }
 0x3ba   :  { %v1418_v43 = vrot.slane %v1313_v59, 4  ;;  %v1421_v16 = vsel %vm127_vm1, %v1313_v59, %v1420_v60 }
 0x3bb   :  { %v1290_v8 = vpop.f32.mrf.mxu3  ;;  %v1429_v2 = vperm.slane %v1421_v16, %v2258_v29 }
 0x3bc   :  { %v1362_v10 = vrot.slane %v1290_v8, 4  ;;  %v1365_v63 = vsel %vm127_vm1, %v1290_v8, %v1364_v41  ;;  %v1419_v1 = vsel %vm127_vm1, %v1418_v43, %v1221_v52 }
 0x3bd   :  { %v1373_v17 = vperm.slane %v1365_v63, %v2258_v29  ;;  %v1425_v13 = vperm.slane %v1419_v1, %v2258_v29  ;;  %v1456_v12 = vrot.slane %v1429_v2, 4 }
 0x3be   :  { %v1363_v62 = vsel %vm127_vm1, %v1362_v10, %v1198_v25 }
 0x3bf   :  { %v1369_v56 = vperm.slane %v1363_v62, %v2258_v29  ;;  %v1399_v28 = vsel %vm127_vm1, %v1398_v15, %v1373_v17  ;;  %v1400_v7 = vrot.slane %v1373_v17, 4  ;;  %v1444_v26 = vrot.slane %v1425_v13, 4 }
 0x3c0   :  { %v1405_v11 = vperm.slane %v1399_v28, %v2268_v44 }
 0x3c1   :  { %v1387_v18 = vsel %vm127_vm1, %v1386_v19, %v1369_v56  ;;  %v1388_v4 = vrot.slane %v1369_v56, 4  ;;  %v1401_v23 = vsel %vm127_vm1, %v1385_v3, %v1400_v7 }
 0x3c2   :  { %v1393_v49 = vperm.slane %v1387_v18, %v2268_v44  ;;  %v1409_v61 = vperm.slane %v1401_v23, %v2268_v44  ;;  %v1414_v5 = vrot.slane %v1405_v11, 4 }
 0x3c3   :  { %v1389_v24 = vsel %vm127_vm1, %v1381_v45, %v1388_v4  ;;  %v1359_v9 = vpop.f32.mrf.mxu2 }
 0x3c4   :  { %v1397_v30 = vperm.slane %v1389_v24, %v2268_v44  ;;  %v1410_v6 = vrot.slane %v1393_v49, 4  ;;  %v1416_v21 = vrot.slane %v1409_v61, 4  ;;  %v1415_v31 = vsel %vm127_vm1, 0.0, %v1414_v5 }
 0x3c5   :  { %v1430_v33 = vrot.slane %v1359_v9, 4  ;;  %v1433_v34 = vsel %vm127_vm1, %v1359_v9, %v1432_v14 }
 0x3c6   :  { %v1412_v58 = vrot.slane %v1397_v30, 4  ;;  %v1417_v0 = vsel %vm127_vm1, 0.0, %v1416_v21  ;;  %v1485_v35 = vsel %vm127_vm1, %v1416_v21, %v1405_v11  ;;  %v1441_v57 = vperm.slane %v1433_v34, %v2258_v29 }
 0x3c7   :  { %v1489_v37 = vperm.slane %v1485_v35, %v2258_v29  ;;  %v1490_v38 = vrot.slane %v1417_v0, 4  ;;  %v1431_v39 = vsel %vm127_vm1, %v1430_v33, %v1267_v51  ;;  %v1411_v42 = vsel %vm127_vm1, 0.0, %v1410_v6 }
 0x3c8   :  { %v1413_v32 = vsel %vm127_vm1, 0.0, %v1412_v58  ;;  %v1437_v40 = vperm.slane %v1431_v39, %v2258_v29  ;;  %v1454_v20 = vrot.slane %v1441_v57, 4  ;;  %v1457_v46 = vsel %vm127_vm1, %v1441_v57, %v1456_v12 }
 0x3c9   :  { %v1491_v22 = vsel %vm127_vm1, %v1490_v38, %v1415_v31  ;;  %v1465_v47 = vperm.slane %v1457_v46, %v2268_v44  ;;  %v1474_v48 = vsel %vm127_vm1, %v1412_v58, %v1393_v49  ;;  %v1479_v50 = vrot.slane %v1413_v32, 4 }
 0x3ca   :  { %v1442_v52 = vrot.slane %v1437_v40, 4  ;;  %v1445_v53 = vsel %vm127_vm1, %v1437_v40, %v1444_v26  ;;  %v1455_v25 = vsel %vm127_vm1, %v1454_v20, %v1429_v2  ;;  %v1478_v54 = vperm.slane %v1474_v48, %v2258_v29 }
 0x3cb   :  { %v1453_v36 = vperm.slane %v1445_v53, %v2268_v44  ;;  %v1461_v55 = vperm.slane %v1455_v25, %v2268_v44  ;;  %v1472_v27 = vrot.slane %v1465_v47, 4  ;;  %v1480_v3 = vsel %vm127_vm1, %v1479_v50, %v1411_v42 }
 0x3cc   :  { %v1443_v59 = vsel %vm127_vm1, %v1442_v52, %v1425_v13  ;;  %v1484_v41 = vperm.slane %v1480_v3, %v2258_v29  ;;  %v1495_v43 = vperm.slane %v1491_v22, %v2258_v29  ;;  %v1498_v60 = vrot.slane %v1478_v54, 4  ;;  %v1615_v3 = vld [vmem:[%s2831_s3 + $0x8] sm:$0xff] }
 0x3cd   :  { %v1449_v45 = vperm.slane %v1443_v59, %v2268_v44  ;;  %v1468_v8 = vrot.slane %v1453_v36, 4  ;;  %v1470_v51 = vrot.slane %v1461_v55, 4  ;;  %v1473_v10 = vsel %vm127_vm1, 0.0, %v1472_v27  ;;  %v1614_v59 = vld [vmem:[%s2831_s3] sm:$0xff] }
 0x3ce   :  { %v1539_v63 = vsel %vm127_vm1, %v1472_v27, %v1461_v55  ;;  %v1544_v15 = vrot.slane %v1473_v10, 4  ;;  %v1499_v16 = vsel %vm127_vm1, %v1484_v41, %v1498_v60  ;;  %v1510_v17 = vrot.slane %v1489_v37, 4  ;;  %v1617_v27 = vld [vmem:[%s2831_s3 + $0x18] sm:$0xff] }
 0x3cf   :  { %v1466_v1 = vrot.slane %v1449_v45, 4  ;;  %v1469_v62 = vsel %vm127_vm1, 0.0, %v1468_v8  ;;  %v1471_v19 = vsel %vm127_vm1, 0.0, %v1470_v51  ;;  %v1528_v56 = vsel %vm127_vm1, %v1468_v8, %v1449_v45  ;;  %1640 = vmatpush.msra.mxu3 %v1617_v27  ;;  %v1764_v27 = vld [vmem:[%s2837_s9 + $0x18] sm:$0xff] }
 0x3d0   :  { %v1533_v28 = vrot.slane %v1469_v62, 4  ;;  %v1507_v7 = vperm.slane %v1499_v16, %v2268_v44  ;;  %v1511_v2 = vsel %vm127_vm1, %v1495_v43, %v1510_v17  ;;  %v1496_v11 = vrot.slane %v1484_v41, 4  ;;  %v1974_v62 = vld [vmem:[%s2832_s4] ss:$0 sm:$0xff] }
 0x3d1   :  { %v1519_v13 = vperm.slane %v1511_v2, %v2268_v44  ;;  %v1508_v18 = vrot.slane %v1495_v43, 4  ;;  %v1467_v4 = vsel %vm127_vm1, 0.0, %v1466_v1  ;;  %v1532_v23 = vperm.slane %v1528_v56, %v2258_v29 }
 0x3d2   :  { %v1526_v49 = vrot.slane %v1507_v7, 4  ;;  %v1497_v61 = vsel %vm127_vm1, %v1496_v11, %v1478_v54  ;;  %v1534_v5 = vsel %vm127_vm1, %v1533_v28, %v1467_v4  ;;  %v1543_v14 = vperm.slane %v1539_v63, %v2258_v29  ;;  %v2023_v28 = vld [vmem:[#allocation2] sm:$0xff] }
 0x3d3   :  { %v1524_v24 = vrot.slane %v1519_v13, 4  ;;  %v1503_v12 = vperm.slane %v1497_v61, %v2268_v44  ;;  %v1509_v30 = vsel %vm127_vm1, %v1508_v18, %v1489_v37  ;;  %v1538_v6 = vperm.slane %v1534_v5, %v2258_v29 }
 0x3d4   :  { %v1527_v21 = vsel %vm127_vm1, %v1519_v13, %v1526_v49  ;;  %v1515_v9 = vperm.slane %v1509_v30, %v2268_v44  ;;  %v1545_v26 = vsel %vm127_vm1, %v1544_v15, %v1471_v19  ;;  %v1552_v31 = vrot.slane %v1532_v23, 4 }
 0x3d5   :  { %v1525_v33 = vsel %vm127_vm1, %v1524_v24, %v1507_v7  ;;  %1600 = vrot.lane.b32.xlu0 %v1527_v21, %s2113_s16  ;;  %v1522_v34 = vrot.slane %v1503_v12, 4  ;;  %v1549_v58 = vperm.slane %v1545_v26, %v2258_v29  ;;  %v1564_v0 = vrot.slane %v1543_v14, 4 }
 0x3d6   :  { %1592 = vrot.lane.b32.xlu1 %v1525_v33, %s2114_s17  ;;  %v1520_v35 = vrot.slane %v1515_v9, 4  ;;  %v1553_v57 = vsel %vm127_vm1, %v1538_v6, %v1552_v31  ;;  %v1550_v37 = vrot.slane %v1538_v6, 4  ;;  %v2115_v24 = vmov 32.0   ;;  %v1725_v33 = vld [vmem:[%s2835_s7 + $0x18] sm:$0xff] }
 0x3d7   :  { %v1523_v38 = vsel %vm127_vm1, %v1515_v9, %v1522_v34  ;;  %v1561_v39 = vperm.slane %v1553_v57, %v2268_v44  ;;  %v1565_v42 = vsel %vm127_vm1, %v1549_v58, %v1564_v0  ;;  %v1562_v32 = vrot.slane %v1549_v58, 4  ;;  %1748 = vmatpush.msrb.mxu0 %v1725_v33  ;;  %v1724_v0 = vld [vmem:[%s2835_s7 + $0x10] sm:$0xff] }
 0x3d8   :  { %1584 = vrot.lane.b32.xlu2 %v1523_v38, %s2105_s19  ;;  %v1573_v40 = vperm.slane %v1565_v42, %v2268_v44  ;;  %v1551_v29 = vsel %vm127_vm1, %v1550_v37, %v1532_v23  ;;  %v1521_v20 = vsel %vm127_vm1, %v1520_v35, %v1503_v12  ;;  %v2024_v23 = vld [vmem:[#allocation2 + $0x8] sm:$0xff]  ;;  %2013 = vrcp.f32 %v2115_v24  ;;  %v1722_v38 = vld [vmem:[%s2835_s7] sm:$0xff] }
 0x3d9   :  { %v1580_v46 = vrot.slane %v1561_v39, 4  ;;  %v1557_v22 = vperm.slane %v1551_v29, %v2268_v44  ;;  %v1563_v47 = vsel %vm127_vm1, %v1562_v32, %v1543_v14  ;;  %1749 = vmatpush.msrb.mxu0 %v1724_v0  ;;  %v1723_v37 = vld [vmem:[%s2835_s7 + $0x8] sm:$0xff] }
 0x3da   :  { %v1578_v48 = vrot.slane %v1573_v40, 4  ;;  %v1569_v50 = vperm.slane %v1563_v47, %v2268_v44  ;;  %v1616_v44 = vld [vmem:[%s2831_s3 + $0x10] sm:$0xff]  ;;  %v1768_v47 = vld [vmem:[%s2837_s9 + $0x38] sm:$0xff]  ;;  %s1875_s3 = sshll.u32 %s2841_s13, 4  ;;  %s1876_s3 = int_to_ptr.hbm [resolvable:$true] %s1875_s3 }
 0x3db   :  { %v1581_v52 = vsel %vm127_vm1, %v1573_v40, %v1580_v46  ;;  %v1576_v53 = vrot.slane %v1557_v22, 4  ;;  %1641 = vmatpush.msra.mxu3 %v1616_v44  ;;  %1750 = vmatpush.msrb.mxu0 %v1723_v37 }
 0x3dc   :  { %v1579_v25 = vsel %vm127_vm1, %v1578_v48, %v1561_v39  ;;  %v1574_v54 = vrot.slane %v1569_v50, 4  ;;  %v1767_v48 = vld [vmem:[%s2837_s9 + $0x30] sm:$0xff]  ;;  %1788 = vmatpush.msra.mxu1 %v1768_v47 }
 0x3dd   :  { %1594 = vrot.lane.b32.xlu0 %v1579_v25, %s2114_s17  ;;  %v1577_v55 = vsel %vm127_vm1, %v1569_v50, %v1576_v53  ;;  %1642 = vmatpush.msra.mxu3 %v1615_v3  ;;  %v1765_v25 = vld [vmem:[%s2837_s9 + $0x20] sm:$0xff] }
 0x3de   :  { %1602 = vrot.lane.b32.xlu1 %v1581_v52, %s2113_s16  ;;  %v1575_v36 = vsel %vm127_vm1, %v1574_v54, %v1557_v22  ;;  %v2014_v12 = vpop.eup %2013  ;;  %1751 = vmatpush.msrb.mxu0 %v1722_v38  ;;  %v1766_v52 = vld [vmem:[%s2837_s9 + $0x28] sm:$0xff] }
 0x3df   :  { %1643 = vmatpush.msra.mxu3 %v1614_v59  ;;  %v1662_v30 = vmul.f32 32.0, %v2014_v12  ;;  %vm1666_vm5 = vweird.f32 %v2014_v12  ;;  %1789 = vmatpush.msra.mxu1 %v1767_v48 }
 0x3e0   :  { %1586 = vrot.lane.b32.xlu2 %v1577_v55, %s2105_s19 }
 0x3e1   :  { %v1663_v6 = vsub.f32 1.0, %v1662_v30  ;;  %1790 = vmatpush.msra.mxu1 %v1766_v52  ;;  %v1978_v30 = vld [vmem:[%s2838_s10] ss:$0 sm:$0xff] }
 0x3e3   :  { %v1664_v21 = vmul.f32 %v2014_v12, %v1663_v6  ;;  %1791 = vmatpush.msra.mxu1 %v1765_v25 }
 0x3e5   :  { %v1665_v9 = vadd.f32 %v2014_v12, %v1664_v21  ;;  %1792 = vmatpush.msra.mxu1 %v1764_v27 }
 0x3e7   :  { %v2742_v26 = vsel %vm1666_vm5, %v2014_v12, %v1665_v9 }
 0x432   :  { %v1585_v41 = vpop.permute.xlu2 %1584 }
 0x433   :  { %v1606_v60 = vsel %vm849_vm2, %v1521_v20, %v1585_v41 }
 0x43a   :  { %v1587_v10 = vpop.permute.xlu2 %1586 }
 0x43b   :  { %v1607_v63 = vsel %vm849_vm2, %v1575_v36, %v1587_v10 }
 0x447   :  { %v1601_v43 = vpop.permute.xlu0 %1600 }
 0x448   :  { %v1593_v45 = vpop.permute.xlu1 %1592 }
 0x449   :  { %v1609_v8 = vsel %vm1608_vm3, %v1606_v60, %v1593_v45 }
 0x44a   :  { %v1612_v51 = vsel %vm1611_vm4, %v1609_v8, %v1601_v43  ;;  %v1975_v8 = vld [vmem:[%s2833_s5] ss:$0 sm:$0xff] }
 0x44b   :  { %1932 = vmatmul.msk.f32.vlgmr.msra.gmra.mxu3 %vm74_vm0, %v1612_v51 }
 0x44f   :  { %v1595_v15 = vpop.permute.xlu0 %1594 }
 0x450   :  { %v1603_v16 = vpop.permute.xlu1 %1602  ;;  %v1610_v17 = vsel %vm1608_vm3, %v1607_v63, %v1595_v15  ;;  %v1976_v15 = vld [vmem:[%s2834_s6] ss:$0 sm:$0xff] }
 0x451   :  { %v1613_v1 = vsel %vm1611_vm4, %v1610_v17, %v1603_v16 }
 0x453   :  { %1933 = vmatmul.msk.f32.gmra.mxu3 %vm74_vm0, %v1613_v1 }
 0x4ce   :  { %v1645_v19 = vpop.f32.mrf.mxu3 }
 0x4cf   :  { %v1646_v56 = vadd.f32 %v1974_v62, %v1645_v19 }
 0x4d1   :  { %v2728_v7 = vadd.f32 %v2023_v28, %v1646_v56 }
 0x4d3   :  { %v1655_v2 = vsel %vm74_vm0, %v2728_v7, 0.0  ;;  %v1670_v11 = vmul.f32 %v2728_v7, %v2728_v7 }
 0x4d4   :  { %1656 = vadd.xlane.f32.xlu2 %v1655_v2 }
 0x4d5   :  { %v1672_v13 = vsel %vm74_vm0, %v1670_v11, 0.0 }
 0x4d6   :  { %1673 = vadd.xlane.f32.xlu0 %v1672_v13  ;;  %v1648_v18 = vpop.f32.mrf.mxu3  ;;  %v1763_v13 = vld [vmem:[%s2837_s9 + $0x10] sm:$0xff] }
 0x4d7   :  { %v1649_v4 = vadd.f32 %v1974_v62, %v1648_v18  ;;  %v1762_v18 = vld [vmem:[%s2837_s9 + $0x8] sm:$0xff]  ;;  %1793 = vmatpush.msra.mxu1 %v1763_v13 }
 0x4d9   :  { %v2735_v49 = vadd.f32 %v2024_v23, %v1649_v4  ;;  %v1761_v4 = vld [vmem:[%s2837_s9] sm:$0xff]  ;;  %1794 = vmatpush.msra.mxu1 %v1762_v18 }
 0x4da   :  { %v1977_v23 = vld [vmem:[%s2836_s8] ss:$0 sm:$0xff]  ;;  %s2116_s8 = smov [#allocation6]  }
 0x4db   :  { %v1658_v61 = vsel %vm74_vm0, %v2735_v49, 0.0  ;;  %v1671_v5 = vmul.f32 %v2735_v49, %v2735_v49  ;;  %1795 = vmatpush.msra.mxu1 %v1761_v4  ;;  %s1886_s9 = sshll.u32 %s2116_s8, 4  ;;  %s1887_s9 = int_to_ptr.vmem [resolvable:$true] %s1886_s9 }
 0x4dc   :  { %1659 = vadd.xlane.f32.xlu1 %v1658_v61  ;;  %1894 = dma.vmem_to_hbm [thread:$0]  %s1887_s9, 1024, %s1889_s22, [#allocation7], %s2104_s18, %s2104_s18, %s2105_s19  }
 0x4dd   :  { %v1675_v14 = vsel %vm74_vm0, %v1671_v5, 0.0 }
 0x4de   :  { %1676 = vadd.xlane.f32.xlu2 %v1675_v14 }
 0x547   :  { %v1657_v31 = vpop.xlane.xlu2 %1656 }
 0x548   :  { %v1668_v34 = vmul.f32 %v2742_v26, %v1657_v31 }
 0x549   :  { %v1674_v58 = vpop.xlane.xlu0 %1673 }
 0x54a   :  { %v1680_v35 = vmul.f32 %v1668_v34, %v1668_v34  ;;  %v1678_v57 = vmul.f32 %v1674_v58, %v2742_v26  ;;  %v1686_v60 = vsub.f32 %v2728_v7, %v1668_v34 }
 0x54c   :  { %v1682_v39 = vsub.f32 %v1678_v57, %v1680_v35 }
 0x54e   :  { %v1684_v42 = vmax.f32 %v1682_v39, 0.0 }
 0x54f   :  { %v1660_v32 = vpop.xlane.xlu1 %1659 }
 0x550   :  { %v1688_v40 = vadd.f32 1e-05, %v1684_v42  ;;  %v1669_v29 = vmul.f32 %v2742_v26, %v1660_v32 }
 0x551   :  { %v1677_v20 = vpop.xlane.xlu2 %1676 }
 0x552   :  { %2015 = vrsqrt.f32 %v1688_v40  ;;  %v1681_v46 = vmul.f32 %v1669_v29, %v1669_v29  ;;  %v1679_v22 = vmul.f32 %v1677_v20, %v2742_v26  ;;  %vm1696_vm7 = vweird.f32 %v1688_v40 }
 0x553   :  { %v1687_v56 = vsub.f32 %v2735_v49, %v1669_v29 }
 0x554   :  { %v1683_v50 = vsub.f32 %v1679_v22, %v1681_v46 }
 0x556   :  { %v1685_v53 = vmax.f32 %v1683_v50, 0.0 }
 0x558   :  { %v2016_v54 = vpop.eup %2015  ;;  %v1689_v55 = vadd.f32 1e-05, %v1685_v53 }
 0x559   :  { %v1691_v36 = vmul.f32 %v2016_v54, %v1688_v40  ;;  %vm1697_vm6 = vweird.f32 %v2016_v54 }
 0x55a   :  { %2017 = vrsqrt.f32 %v1689_v55  ;;  %vm1698_vm8 = vmor %vm1696_vm7, %vm1697_vm6  ;;  %vm1706_vm10 = vweird.f32 %v1689_v55 }
 0x55b   :  { %v1692_v44 = vmul.f32 %v2016_v54, %v1691_v36 }
 0x55d   :  { %v1693_v3 = vmul.f32 0.5, %v1692_v44 }
 0x55f   :  { %v1694_v59 = vsub.f32 1.5, %v1693_v3 }
 0x560   :  { %v2018_v41 = vpop.eup %2017 }
 0x561   :  { %v1695_v43 = vmul.f32 %v2016_v54, %v1694_v59  ;;  %v1701_v45 = vmul.f32 %v2018_v41, %v1689_v55  ;;  %vm1707_vm9 = vweird.f32 %v2018_v41 }
 0x562   :  { %vm1708_vm11 = vmor %vm1706_vm10, %vm1707_vm9 }
 0x563   :  { %v1699_v51 = vsel %vm1698_vm8, %v2016_v54, %v1695_v43  ;;  %v1702_v63 = vmul.f32 %v2018_v41, %v1701_v45 }
 0x564   :  { %v1710_v10 = vmul.f32 %v1699_v51, %v1686_v60 }
 0x565   :  { %v1703_v16 = vmul.f32 0.5, %v1702_v63  ;;  %v1980_v63 = vld [vmem:[%s2840_s12] ss:$0 sm:$0xff] }
 0x566   :  { %v1715_v17 = vmul.f32 %v1975_v8, %v1710_v10 }
 0x567   :  { %v1704_v1 = vsub.f32 1.5, %v1703_v16 }
 0x568   :  { %v1720_v62 = vadd.f32 %v1976_v15, %v1715_v17 }
 0x569   :  { %v1705_v19 = vmul.f32 %v2018_v41, %v1704_v1 }
 0x56a   :  { %1934 = vmatmul.msk.f32.vlgmr.msrb.gmra.mxu0 %vm74_vm0, %v1720_v62 }
 0x56b   :  { %v1709_v28 = vsel %vm1708_vm11, %v2018_v41, %v1705_v19 }
 0x56c   :  { %v1711_v7 = vmul.f32 %v1709_v28, %v1687_v56 }
 0x56e   :  { %v1716_v2 = vmul.f32 %v1975_v8, %v1711_v7 }
 0x570   :  { %v1721_v11 = vadd.f32 %v1976_v15, %v1716_v2 }
 0x572   :  { %1935 = vmatmul.msk.f32.gmra.mxu0 %vm74_vm0, %v1721_v11 }
 0x5e7   :  { %v1753_v49 = vpop.f32.mrf.mxu0 }
 0x5e8   :  { %v1754_v61 = vadd.f32 %v1977_v23, %v1753_v49 }
 0x5ea   :  { %v1759_v5 = vmax.f32 %v1754_v61, 0.0 }
 0x5ec   :  { %1936 = vmatmul.msk.f32.vlgmr.msra.gmra.mxu1 %vm1773_vm12, %v1759_v5 }
 0x5ef   :  { %v1756_v14 = vpop.f32.mrf.mxu0 }
 0x5f0   :  { %v1757_v24 = vadd.f32 %v1977_v23, %v1756_v14 }
 0x5f2   :  { %v1760_v12 = vmax.f32 %v1757_v24, 0.0 }
 0x5f4   :  { %1937 = vmatmul.msk.f32.gmra.mxu1 %vm1773_vm12, %v1760_v12 }
 0x669   :  { %v1797_v6 = vpop.f32.mrf.mxu1 }
 0x66a   :  { %v1798_v21 = vadd.f32 %v1978_v30, %v1797_v6 }
 0x66c   :  { %v1803_v9 = vadd.f32 %v1798_v21, %v1720_v62 }
 0x66e   :  { %v1807_v31 = vsel %vm74_vm0, %v1803_v9, 0.0  ;;  %v1815_v33 = vmul.f32 %v1803_v9, %v1803_v9 }
 0x66f   :  { %1808 = vadd.xlane.f32.xlu0 %v1807_v31 }
 0x670   :  { %v1817_v34 = vsel %vm74_vm0, %v1815_v33, 0.0 }
 0x671   :  { %1818 = vadd.xlane.f32.xlu2 %v1817_v34  ;;  %v1800_v58 = vpop.f32.mrf.mxu1 }
 0x672   :  { %v1801_v0 = vadd.f32 %v1978_v30, %v1800_v58 }
 0x674   :  { %v1804_v35 = vadd.f32 %v1801_v0, %v1721_v11 }
 0x676   :  { %v1810_v57 = vsel %vm74_vm0, %v1804_v35, 0.0  ;;  %v1816_v37 = vmul.f32 %v1804_v35, %v1804_v35 }
 0x677   :  { %1811 = vadd.xlane.f32.xlu1 %v1810_v57 }
 0x678   :  { %v1820_v38 = vsel %vm74_vm0, %v1816_v37, 0.0 }
 0x679   :  { %1821 = vadd.xlane.f32.xlu0 %v1820_v38 }
 0x6e2   :  { %v1809_v39 = vpop.xlane.xlu0 %1808 }
 0x6e3   :  { %v1813_v42 = vmul.f32 %v1809_v39, %v2742_v26 }
 0x6e4   :  { %v1819_v32 = vpop.xlane.xlu2 %1818 }
 0x6e5   :  { %v1825_v40 = vmul.f32 %v1813_v42, %v1813_v42  ;;  %v1823_v29 = vmul.f32 %v1819_v32, %v2742_v26  ;;  %v1831_v60 = vsub.f32 %v1803_v9, %v1813_v42 }
 0x6e7   :  { %v1827_v20 = vsub.f32 %v1823_v29, %v1825_v40 }
 0x6e9   :  { %v1829_v46 = vmax.f32 %v1827_v20, 0.0 }
 0x6ea   :  { %v1812_v47 = vpop.xlane.xlu1 %1811 }
 0x6eb   :  { %v1833_v22 = vadd.f32 1e-05, %v1829_v46  ;;  %v1814_v48 = vmul.f32 %v1812_v47, %v2742_v26 }
 0x6ec   :  { %v1822_v50 = vpop.xlane.xlu0 %1821 }
 0x6ed   :  { %2019 = vrsqrt.f32 %v1833_v22  ;;  %v1826_v52 = vmul.f32 %v1814_v48, %v1814_v48  ;;  %v1824_v53 = vmul.f32 %v1822_v50, %v2742_v26  ;;  %vm1841_vm14 = vweird.f32 %v1833_v22  ;;  %v1979_v26 = vld [vmem:[%s2839_s11] ss:$0 sm:$0xff]  ;;  %s2117_s11 = smov [#allocation5]  }
 0x6ee   :  { %v1832_v19 = vsub.f32 %v1804_v35, %v1814_v48  ;;  %s1873_s24 = sshll.u32 %s2117_s11, 4  ;;  %s1874_s24 = int_to_ptr.vmem [resolvable:$true] %s1873_s24 }
 0x6ef   :  { %v1828_v25 = vsub.f32 %v1824_v53, %v1826_v52 }
 0x6f1   :  { %v1830_v54 = vmax.f32 %v1828_v25, 0.0 }
 0x6f3   :  { %v2020_v36 = vpop.eup %2019  ;;  %v1834_v27 = vadd.f32 1e-05, %v1830_v54 }
 0x6f4   :  { %v1836_v55 = vmul.f32 %v2020_v36, %v1833_v22  ;;  %vm1842_vm13 = vweird.f32 %v2020_v36 }
 0x6f5   :  { %2021 = vrsqrt.f32 %v1834_v27  ;;  %vm1843_vm15 = vmor %vm1841_vm14, %vm1842_vm13  ;;  %vm1851_vm2 = vweird.f32 %v1834_v27 }
 0x6f6   :  { %v1837_v44 = vmul.f32 %v2020_v36, %v1836_v55 }
 0x6f8   :  { %v1838_v3 = vmul.f32 0.5, %v1837_v44 }
 0x6fa   :  { %v1839_v59 = vsub.f32 1.5, %v1838_v3 }
 0x6fb   :  { %v2022_v41 = vpop.eup %2021 }
 0x6fc   :  { %v1840_v43 = vmul.f32 %v2020_v36, %v1839_v59  ;;  %v1846_v45 = vmul.f32 %v2022_v41, %v1834_v27  ;;  %vm1852_vm1 = vweird.f32 %v2022_v41 }
 0x6fd   :  { %vm1853_vm3 = vmor %vm1851_vm2, %vm1852_vm1 }
 0x6fe   :  { %v1844_v8 = vsel %vm1843_vm15, %v2020_v36, %v1840_v43  ;;  %v1847_v10 = vmul.f32 %v2022_v41, %v1846_v45 }
 0x6ff   :  { %v1855_v51 = vmul.f32 %v1844_v8, %v1831_v60 }
 0x700   :  { %v1848_v15 = vmul.f32 0.5, %v1847_v10 }
 0x701   :  { %v1860_v16 = vmul.f32 %v1979_v26, %v1855_v51 }
 0x702   :  { %v1849_v17 = vsub.f32 1.5, %v1848_v15 }
 0x703   :  { %v1865_v1 = vadd.f32 %v1980_v63, %v1860_v16 }
 0x704   :  { %v1850_v62 = vmul.f32 %v2022_v41, %v1849_v17 }
 0x705   :  { %1867 = vst.msk [vmem:[#allocation5] sm:$0xff] %vm74_vm0, %v1865_v1 }
 0x706   :  { %v1854_v56 = vsel %vm1853_vm3, %v2022_v41, %v1850_v62 }
 0x707   :  { %v1856_v28 = vmul.f32 %v1854_v56, %v1832_v19 }
 0x709   :  { %v1861_v7 = vmul.f32 %v1979_v26, %v1856_v28 }
 0x70b   :  { %v1866_v2 = vadd.f32 %v1980_v63, %v1861_v7 }
 0x70d   :  { %1868 = vst.msk [vmem:[#allocation5 + $0x8] sm:$0xff] %vm74_vm0, %v1866_v2 }
 0x70e   :  { %1881 = dma.vmem_to_hbm [thread:$0]  %s1874_s24, 256, %s1876_s3, [#allocation4], %s2104_s18, %s2104_s18, %s2105_s19  }
 0x70f   :  { %2099 = dma.done.wait [#allocation4], 256  }
 0x710   :  { %2100 = vsyncadd [#allocation4], 4294967040 }
 0x711   :  { %2101 = dma.done.wait [#allocation7], 1024  }
 0x712   :  { %2102 = vsyncadd [#allocation7], 4294966272 }
 0x713   :  { %1903 = vsyncpa [#allocation3], 1 }
 0x714   :  { %1904 = vsyncpa [#allocation4], 1 }
 0x715   :  { %1905 = vsyncpa [#allocation7], 1 }

</bundles_post_ra>
